<compile_context>
chip_gen: v5e
topology: v5e:2x2
jax: 0.10.0
libtpu: 0.0.40
codegen_flags: <defaults>
</compile_context>

<pallas_src>
import functools

import numpy as np
import jax
import jax.numpy as jnp
from jax.experimental import pallas as pl
from jax.experimental.pallas import tpu as pltpu


# ----------------------------------------------------------------------------
# Fused kernel: conv stack + GAP + projectors + text MLP + fusion MLP + softmax
# ----------------------------------------------------------------------------
def _fused_kernel(*refs, conv_meta, n_text, n_fusion_mid):
    o_ref = refs[-1]
    it = iter(refs[:-1])
    img_ref = next(it)                        # (1, bt*Hp1, W1*Cin)
    txt_ref = next(it)                        # (1, bt, vocab)

    # ---- convolutional feature extractor (all layers stay in VMEM/vregs) ----
    a = img_ref[0]                            # (bt*Hp1, W1*Cin), zero pad rows
    n_conv = len(conv_meta)
    img = None
    for li, (K, nb, pool, WC, C) in enumerate(conv_meta):
        m_ref = next(it)                      # (K, IC, W*Cout)  BN scale folded
        b_ref = next(it)                      # (1, W*Cout)      BN beta tiled
        # K row-band matmuls; contraction depth = IC, 128-lane-wide result.
        y = jnp.dot(a[0:nb, :], m_ref[0], preferred_element_type=jnp.float32)
        for kh in range(1, K):
            y = y + jnp.dot(a[kh:kh + nb, :], m_ref[kh],
                            preferred_element_type=jnp.float32)
        y = jnp.maximum(y + b_ref[...], 0.0)          # folded BN + ReLU
        if pool:                                      # fused MaxPool2d(2, 2)
            y = jnp.maximum(y[:-1, :], y[1:, :])      # row-pair max
            y = jnp.maximum(y[:, :WC - C], y[:, C:])  # col-pair max / channel
        if li < n_conv - 1:
            # Row select (stride 2 if pooled) + zero-pad-row placement for the
            # next layer; block-diagonal over the bt stacked images.
            p_ref = next(it)
            a = jnp.dot(p_ref[...], y, preferred_element_type=jnp.float32)
        else:
            # AdaptiveAvgPool2d((1,1)): sum valid pooled rows, then select the
            # valid column groups scaled by 1/(Hf*Wf).
            prow_ref = next(it)               # (bt, rows)
            ssel_ref = next(it)               # (cols, Cf)
            rows = jnp.dot(prow_ref[...], y, preferred_element_type=jnp.float32)
            img = jnp.dot(rows, ssel_ref[...], preferred_element_type=jnp.float32)

    # ---- image_projector -----------------------------------------------------
    w_ip = next(it); b_ip = next(it)
    img = jnp.dot(img, w_ip[...], preferred_element_type=jnp.float32) + b_ip[...]

    # ---- text_fc (one-hot-encoder MLP) + text_projector ----------------------
    t = txt_ref[0]                            # (bt, vocab)
    for i in range(n_text):
        w = next(it); b = next(it)
        t = jnp.dot(t, w[...], preferred_element_type=jnp.float32) + b[...]
        if i < n_text - 1:                    # last text Linear has no ReLU
            t = jnp.maximum(t, 0.0)
    w_tp = next(it); b_tp = next(it)
    t = jnp.dot(t, w_tp[...], preferred_element_type=jnp.float32) + b_tp[...]

    # ---- fc_fusion: concat folded into a split first matmul; BatchNorm1d(eval)
    #      folded into its weights; Dropout = identity -------------------------
    w0i = next(it); w0t = next(it); b0 = next(it)
    h = (jnp.dot(img, w0i[...], preferred_element_type=jnp.float32)
         + jnp.dot(t, w0t[...], preferred_element_type=jnp.float32) + b0[...])
    h = jnp.maximum(h, 0.0)
    for _ in range(n_fusion_mid):
        w = next(it); b = next(it)
        h = jnp.maximum(
            jnp.dot(h, w[...], preferred_element_type=jnp.float32) + b[...], 0.0)
    w_last = next(it); b_last = next(it)
    h = jnp.dot(h, w_last[...], preferred_element_type=jnp.float32) + b_last[...]

    # ---- Softmax(dim=1), exact divide ----------------------------------------
    h = h - jnp.max(h, axis=-1, keepdims=True)
    e = jnp.exp(h)
    o_ref[0] = e / jnp.sum(e, axis=-1, keepdims=True)


# ----------------------------------------------------------------------------
# Parameter preprocessing (band weights + selection matrices, built once)
# ----------------------------------------------------------------------------
def build_params(key, config, in_channels, num_classes, common_dim, vocab_size,
                 text_encoder_dim_output, spatial, bt=1):
    k = int(config["kernel_size"])
    p = k // 2
    filters = [int(f) for f in config["filters"]]
    lpb = int(config["layers_per_block"])
    use_pooling = bool(config.get("use_pooling", True))
    eps = 1e-5
    keys = iter(jax.random.split(key, 512))

    def dense(din, dout):
        w = jax.random.normal(next(keys), (din, dout), jnp.float32) / jnp.sqrt(
            jnp.float32(din))
        b = 0.01 * jax.random.normal(next(keys), (1, dout), jnp.float32)
        return w, b

    # Conv layer sequence: (cin, cout, H, W, pool_after_this_conv)
    descs = []
    cin = int(in_channels)
    H = W = int(spatial)
    for cout in filters:
        for li in range(lpb):
            pool = use_pooling and (li == lpb - 1)   # MaxPool closes each block
            descs.append((cin, int(cout), H, W, pool))
            cin = int(cout)
            if pool:
                H, W = H // 2, W // 2

    conv_layers, conv_meta = [], []
    for idx, (cin_l, cout_l, H_l, W_l, pool_l) in enumerate(descs):
        Hp_l = H_l + 2 * p                    # padded rows per image
        nb_l = bt * Hp_l - (k - 1)            # band rows over the stacked tile
        if idx == 0:
            s_in, ic = 1, W_l * cin_l         # compact column layout
        else:
            _, pc, _, pw, ppool = descs[idx - 1]
            s_in = 2 if ppool else 1          # previous pool left stride-2 cols
            ic = (pw - 1) * pc if ppool else pw * pc

        w4 = np.asarray(jax.random.normal(next(keys), (k, k, cin_l, cout_l),
                                          jnp.float32)) / np.sqrt(k * k * cin_l)
        gamma = np.asarray(1.0 + 0.1 * jax.random.normal(next(keys), (cout_l,),
                                                         jnp.float32))
        beta = np.asarray(0.1 * jax.random.normal(next(keys), (cout_l,),
                                                  jnp.float32))
        scale = gamma / np.sqrt(1.0 + eps)    # BN2d eval (running mean=0, var=1)
        w4s = (w4 * scale[None, None, None, :]).astype(np.float32)

        # Band weights over the compact input layout.  Taps reading the implicit
        # column zero-padding (or the stale odd columns of the previous fused
        # pool) simply get zero/absent rows -> the old Q matmul disappears.
        M = np.zeros((k, ic, W_l * cout_l), np.float32)
        for kh in range(k):
            for kw in range(k):
                for wo in range(W_l):
                    wi = wo + kw - p
                    if 0 <= wi < W_l:
                        c0 = s_in * wi * cin_l
                        M[kh, c0:c0 + cin_l,
                          wo * cout_l:(wo + 1) * cout_l] = w4s[kh, kw]
        bias_t = np.tile(beta.astype(np.float32), W_l).reshape(1, W_l * cout_l)

        last = idx == len(descs) - 1
        src = nb_l - 1 if pool_l else nb_l    # rows after the optional pool
        if not last:
            H_next = H_l // 2 if pool_l else H_l
            Hp_next = H_next + 2 * p
            P = np.zeros((bt * Hp_next, src), np.float32)   # block-diagonal
            for b in range(bt):
                for r in range(H_next):
                    P[b * Hp_next + p + r,
                      b * Hp_l + (2 * r if pool_l else r)] = 1.0
            conv_layers.append(dict(m=jnp.asarray(M), bias=jnp.asarray(bias_t),
                                    rowsel=jnp.asarray(P)))
        else:
            Hf = H_l // 2 if pool_l else H_l
            Wf = W_l // 2 if pool_l else W_l
            Prow = np.zeros((bt, src), np.float32)
            for b in range(bt):
                for r in range(Hf):
                    Prow[b, b * Hp_l + (2 * r if pool_l else r)] = 1.0
            cols = (W_l - 1) * cout_l if pool_l else W_l * cout_l
            Ssel = np.zeros((cols, cout_l), np.float32)
            for wo in range(Wf):
                c0 = (2 * wo if pool_l else wo) * cout_l
                for c in range(cout_l):
                    Ssel[c0 + c, c] = 1.0 / float(Hf * Wf)
            conv_layers.append(dict(m=jnp.asarray(M), bias=jnp.asarray(bias_t),
                                    prow=jnp.asarray(Prow),
                                    ssel=jnp.asarray(Ssel)))
        conv_meta.append((int(k), int(nb_l), bool(pool_l),
                          int(W_l * cout_l), int(cout_l)))

    # ---- dense tail ----------------------------------------------------------
    cnn_dim = filters[-1]
    w_ip, b_ip = dense(cnn_dim, common_dim)                    # image_projector
    Ht = int(config["neurons_per_layer_size_of_text_fc"])
    nltf = int(config["num_layers_text_fc"])
    text_layers = ([dense(vocab_size, Ht)]
                   + [dense(Ht, Ht) for _ in range(nltf)]
                   + [dense(Ht, text_encoder_dim_output)])     # text_fc
    w_tp, b_tp = dense(text_encoder_dim_output, common_dim)    # text_projector

    Hfu = int(config["neurons_per_layer_size_of_fc_module"])
    nlf = int(config["num_layers_fc_module"])
    w0, b0 = dense(common_dim * 2, Hfu)                        # fc_fusion[0]
    gamma = 1.0 + 0.1 * jax.random.normal(next(keys), (Hfu,), jnp.float32)
    beta = 0.1 * jax.random.normal(next(keys), (Hfu,), jnp.float32)
    s = gamma / jnp.sqrt(1.0 + eps)          # BatchNorm1d (eval) folded
    w0 = w0 * s[None, :]
    b0 = b0 * s[None, :] + beta[None, :]
    fusion_mid = [dense(Hfu, Hfu) for _ in range(nlf)]
    w_last, b_last = dense(Hfu, num_classes)

    tail = dict(w_ip=w_ip, b_ip=b_ip, text_layers=text_layers, w_tp=w_tp,
                b_tp=b_tp, w0_img=w0[:common_dim, :], w0_txt=w0[common_dim:, :],
                b0=b0, fusion_mid=fusion_mid, w_last=w_last, b_last=b_last)

    return dict(conv_layers=conv_layers, conv_meta=conv_meta, tail=tail,
                p=p, bt=int(bt), num_classes=int(num_classes))


# ----------------------------------------------------------------------------
# Forward pass (attention_mecanism == 'concatenation')
# ----------------------------------------------------------------------------
def _const_spec(shape):
    nd = len(shape)
    return pl.BlockSpec(shape, lambda i: (0,) * nd)   # grid-invariant weight


def dynamic_cnn_forward(params, image_nchw, text_metadata):
    B, Cin, H, W = image_nchw.shape
    bt, p = params["bt"], params["p"]
    assert B % bt == 0, "batch must be divisible by the batch tile"
    nt = B // bt
    Hp = H + 2 * p
    vocab = text_metadata.shape[-1]
    num_classes = params["num_classes"]

    # NCHW -> NHWC, zero-pad rows only (column padding is folded into the band
    # weights), row-flatten, then stack bt images per grid tile.
    x = jnp.transpose(image_nchw, (0, 2, 3, 1))
    x = jnp.pad(x, ((0, 0), (p, p), (0, 0), (0, 0)))
    x = x.reshape(nt, bt * Hp, W * Cin)
    txt = text_metadata.reshape(nt, bt, vocab)

    args = [x, txt]
    specs = [pl.BlockSpec((1, bt * Hp, W * Cin), lambda i: (i, 0, 0)),
             pl.BlockSpec((1, bt, vocab), lambda i: (i, 0, 0))]
    n_conv = len(params["conv_layers"])
    for li, lp in enumerate(params["conv_layers"]):
        names = ("m", "bias", "rowsel") if li < n_conv - 1 else \
                ("m", "bias", "prow", "ssel")
        for nm in names:
            args.append(lp[nm])
            specs.append(_const_spec(lp[nm].shape))
    tp = params["tail"]
    tail_arrays = [tp["w_ip"], tp["b_ip"]]
    for (w, b) in tp["text_layers"]:
        tail_arrays += [w, b]
    tail_arrays += [tp["w_tp"], tp["b_tp"], tp["w0_img"], tp["w0_txt"], tp["b0"]]
    for (w, b) in tp["fusion_mid"]:
        tail_arrays += [w, b]
    tail_arrays += [tp["w_last"], tp["b_last"]]
    for arr in tail_arrays:
        args.append(arr)
        specs.append(_const_spec(arr.shape))

    kern = functools.partial(_fused_kernel,
                             conv_meta=tuple(params["conv_meta"]),
                             n_text=len(tp["text_layers"]),
                             n_fusion_mid=len(tp["fusion_mid"]))
    out = pl.pallas_call(
        kern,
        out_shape=jax.ShapeDtypeStruct((nt, bt, num_classes), jnp.float32),
        grid=(nt,),
        in_specs=specs,
        out_specs=pl.BlockSpec((1, bt, num_classes), lambda i: (i, 0, 0)),
        compiler_params=pltpu.CompilerParams(
            dimension_semantics=("parallel",)),   # batch tiles -> v7x megacore
    )(*args)
    # NOTE: the self-/cross-attention blocks of the reference forward are
    # computed but discarded on the 'concatenation' branch -> dead compute,
    # omitted here (output-equivalent).
    # TODO(synk): MetaBlock / GatedAlteredResidualBlock are undefined in the
    # source module (only used by other attention branches); not implemented.
    return out.reshape(B, num_classes)


# ----------------------------------------------------------------------------
if __name__ == "__main__":
    config = {
        "kernel_size": 3,
        "filters": [8, 16, 32],
        "layers_per_block": 1,
        "use_pooling": True,
        "num_layers_text_fc": 1,
        "neurons_per_layer_size_of_text_fc": 32,
        "num_layers_fc_module": 1,
        "neurons_per_layer_size_of_fc_module": 64,
    }
    B, in_channels, spatial = 2, 4, 16
    num_classes, common_dim, vocab_size, text_out = 10, 32, 16, 32

    key = jax.random.PRNGKey(0)
    kp, ki, kt = jax.random.split(key, 3)
    params = build_params(kp, config, in_channels, num_classes, common_dim,
                          vocab_size, text_out, spatial, bt=1)

    image = jax.random.normal(ki, (B, in_channels, spatial, spatial), jnp.float32)
    text_metadata = jax.random.normal(kt, (B, vocab_size), jnp.float32)

    fwd = jax.jit(lambda img, txt: dynamic_cnn_forward(params, img, txt))
    out = jax.block_until_ready(fwd(image, text_metadata))

    assert out.shape == (B, num_classes), out.shape
    assert bool(jnp.all(jnp.isfinite(out)))
    assert bool(jnp.allclose(jnp.sum(out, axis=-1), 1.0, atol=1e-4))
    print("KERNEL_OK")
</pallas_src>

<mosaic_0001>
module attributes {stable_mosaic.version = 11 : i64} {
  func.func @_fused_kernel(%arg0: i32, %arg1: memref<1x18x64xf32, #tpu.memory_space<vmem>>, %arg2: memref<1x1x16xf32, #tpu.memory_space<vmem>>, %arg3: memref<3x64x128xf32, #tpu.memory_space<vmem>>, %arg4: memref<1x128xf32, #tpu.memory_space<vmem>>, %arg5: memref<10x15xf32, #tpu.memory_space<vmem>>, %arg6: memref<3x120x128xf32, #tpu.memory_space<vmem>>, %arg7: memref<1x128xf32, #tpu.memory_space<vmem>>, %arg8: memref<6x7xf32, #tpu.memory_space<vmem>>, %arg9: memref<3x112x128xf32, #tpu.memory_space<vmem>>, %arg10: memref<1x128xf32, #tpu.memory_space<vmem>>, %arg11: memref<1x3xf32, #tpu.memory_space<vmem>>, %arg12: memref<96x32xf32, #tpu.memory_space<vmem>>, %arg13: memref<32x32xf32, #tpu.memory_space<vmem>>, %arg14: memref<1x32xf32, #tpu.memory_space<vmem>>, %arg15: memref<16x32xf32, #tpu.memory_space<vmem>>, %arg16: memref<1x32xf32, #tpu.memory_space<vmem>>, %arg17: memref<32x32xf32, #tpu.memory_space<vmem>>, %arg18: memref<1x32xf32, #tpu.memory_space<vmem>>, %arg19: memref<32x32xf32, #tpu.memory_space<vmem>>, %arg20: memref<1x32xf32, #tpu.memory_space<vmem>>, %arg21: memref<32x32xf32, #tpu.memory_space<vmem>>, %arg22: memref<1x32xf32, #tpu.memory_space<vmem>>, %arg23: memref<32x64xf32, #tpu.memory_space<vmem>>, %arg24: memref<32x64xf32, #tpu.memory_space<vmem>>, %arg25: memref<1x64xf32, #tpu.memory_space<vmem>>, %arg26: memref<64x64xf32, #tpu.memory_space<vmem>>, %arg27: memref<1x64xf32, #tpu.memory_space<vmem>>, %arg28: memref<64x10xf32, #tpu.memory_space<vmem>>, %arg29: memref<1x10xf32, #tpu.memory_space<vmem>>, %arg30: memref<1x1x10xf32, #tpu.memory_space<vmem>>) attributes {dimension_semantics = [#tpu.dimension_semantics<parallel>], iteration_bounds = array<i64: 2>, scalar_prefetch = 0 : i64, scratch_operands = 0 : i64, tpu.core_type = #tpu.core_type<tc>, window_params = [{transform_indices = @transform_0, window_bounds = array<i64: 1, 18, 64>}, {transform_indices = @transform_1, window_bounds = array<i64: 1, 1, 16>}, {pipeline_mode = #tpu.pipeline_mode<synchronous>, transform_indices = @transform_2, window_bounds = array<i64: 3, 64, 128>}, {pipeline_mode = #tpu.pipeline_mode<synchronous>, transform_indices = @transform_3, window_bounds = array<i64: 1, 128>}, {pipeline_mode = #tpu.pipeline_mode<synchronous>, transform_indices = @transform_4, window_bounds = array<i64: 10, 15>}, {pipeline_mode = #tpu.pipeline_mode<synchronous>, transform_indices = @transform_5, window_bounds = array<i64: 3, 120, 128>}, {pipeline_mode = #tpu.pipeline_mode<synchronous>, transform_indices = @transform_6, window_bounds = array<i64: 1, 128>}, {pipeline_mode = #tpu.pipeline_mode<synchronous>, transform_indices = @transform_7, window_bounds = array<i64: 6, 7>}, {pipeline_mode = #tpu.pipeline_mode<synchronous>, transform_indices = @transform_8, window_bounds = array<i64: 3, 112, 128>}, {pipeline_mode = #tpu.pipeline_mode<synchronous>, transform_indices = @transform_9, window_bounds = array<i64: 1, 128>}, {pipeline_mode = #tpu.pipeline_mode<synchronous>, transform_indices = @transform_10, window_bounds = array<i64: 1, 3>}, {pipeline_mode = #tpu.pipeline_mode<synchronous>, transform_indices = @transform_11, window_bounds = array<i64: 96, 32>}, {pipeline_mode = #tpu.pipeline_mode<synchronous>, transform_indices = @transform_12, window_bounds = array<i64: 32, 32>}, {pipeline_mode = #tpu.pipeline_mode<synchronous>, transform_indices = @transform_13, window_bounds = array<i64: 1, 32>}, {pipeline_mode = #tpu.pipeline_mode<synchronous>, transform_indices = @transform_14, window_bounds = array<i64: 16, 32>}, {pipeline_mode = #tpu.pipeline_mode<synchronous>, transform_indices = @transform_15, window_bounds = array<i64: 1, 32>}, {pipeline_mode = #tpu.pipeline_mode<synchronous>, transform_indices = @transform_16, window_bounds = array<i64: 32, 32>}, {pipeline_mode = #tpu.pipeline_mode<synchronous>, transform_indices = @transform_17, window_bounds = array<i64: 1, 32>}, {pipeline_mode = #tpu.pipeline_mode<synchronous>, transform_indices = @transform_18, window_bounds = array<i64: 32, 32>}, {pipeline_mode = #tpu.pipeline_mode<synchronous>, transform_indices = @transform_19, window_bounds = array<i64: 1, 32>}, {pipeline_mode = #tpu.pipeline_mode<synchronous>, transform_indices = @transform_20, window_bounds = array<i64: 32, 32>}, {pipeline_mode = #tpu.pipeline_mode<synchronous>, transform_indices = @transform_21, window_bounds = array<i64: 1, 32>}, {pipeline_mode = #tpu.pipeline_mode<synchronous>, transform_indices = @transform_22, window_bounds = array<i64: 32, 64>}, {pipeline_mode = #tpu.pipeline_mode<synchronous>, transform_indices = @transform_23, window_bounds = array<i64: 32, 64>}, {pipeline_mode = #tpu.pipeline_mode<synchronous>, transform_indices = @transform_24, window_bounds = array<i64: 1, 64>}, {pipeline_mode = #tpu.pipeline_mode<synchronous>, transform_indices = @transform_25, window_bounds = array<i64: 64, 64>}, {pipeline_mode = #tpu.pipeline_mode<synchronous>, transform_indices = @transform_26, window_bounds = array<i64: 1, 64>}, {pipeline_mode = #tpu.pipeline_mode<synchronous>, transform_indices = @transform_27, window_bounds = array<i64: 64, 10>}, {pipeline_mode = #tpu.pipeline_mode<synchronous>, transform_indices = @transform_28, window_bounds = array<i64: 1, 10>}, {transform_indices = @transform_29, window_bounds = array<i64: 1, 1, 10>}]} {
    %c0 = arith.constant 0 : index
    %c0_0 = arith.constant 0 : index
    %c0_1 = arith.constant 0 : index
    %0 = vector.load %arg1[%c0, %c0_0, %c0_1] : memref<1x18x64xf32, #tpu.memory_space<vmem>>, vector<1x18x64xf32>
    %1 = vector.shape_cast %0 : vector<1x18x64xf32> to vector<18x64xf32>
    %2 = vector.extract_strided_slice %1 {offsets = [0, 0], sizes = [16, 64], strides = [1, 1]} : vector<18x64xf32> to vector<16x64xf32>
    %c0_2 = arith.constant 0 : index
    %c0_3 = arith.constant 0 : index
    %c0_4 = arith.constant 0 : index
    %3 = vector.load %arg3[%c0_2, %c0_3, %c0_4] : memref<3x64x128xf32, #tpu.memory_space<vmem>>, vector<1x64x128xf32>
    %4 = vector.shape_cast %3 : vector<1x64x128xf32> to vector<64x128xf32>
    %cst = arith.constant dense<0.000000e+00> : vector<16x128xf32>
    %5 = tpu.matmul %2, %4, %cst {dimension_numbers = #tpu.dot_dimension_numbers<[1], [0], [0], [1], [0, 0, 1, 1], [], []>} : vector<16x64xf32>, vector<64x128xf32>, vector<16x128xf32> -> vector<16x128xf32>
    %6 = vector.extract_strided_slice %1 {offsets = [1, 0], sizes = [16, 64], strides = [1, 1]} : vector<18x64xf32> to vector<16x64xf32>
    %c1 = arith.constant 1 : index
    %c0_5 = arith.constant 0 : index
    %c0_6 = arith.constant 0 : index
    %7 = vector.load %arg3[%c1, %c0_5, %c0_6] : memref<3x64x128xf32, #tpu.memory_space<vmem>>, vector<1x64x128xf32>
    %8 = vector.shape_cast %7 : vector<1x64x128xf32> to vector<64x128xf32>
    %cst_7 = arith.constant dense<0.000000e+00> : vector<16x128xf32>
    %9 = tpu.matmul %6, %8, %cst_7 {dimension_numbers = #tpu.dot_dimension_numbers<[1], [0], [0], [1], [0, 0, 1, 1], [], []>} : vector<16x64xf32>, vector<64x128xf32>, vector<16x128xf32> -> vector<16x128xf32>
    %10 = arith.addf %5, %9 : vector<16x128xf32>
    %11 = vector.extract_strided_slice %1 {offsets = [2, 0], sizes = [16, 64], strides = [1, 1]} : vector<18x64xf32> to vector<16x64xf32>
    %c2 = arith.constant 2 : index
    %c0_8 = arith.constant 0 : index
    %c0_9 = arith.constant 0 : index
    %12 = vector.load %arg3[%c2, %c0_8, %c0_9] : memref<3x64x128xf32, #tpu.memory_space<vmem>>, vector<1x64x128xf32>
    %13 = vector.shape_cast %12 : vector<1x64x128xf32> to vector<64x128xf32>
    %cst_10 = arith.constant dense<0.000000e+00> : vector<16x128xf32>
    %14 = tpu.matmul %11, %13, %cst_10 {dimension_numbers = #tpu.dot_dimension_numbers<[1], [0], [0], [1], [0, 0, 1, 1], [], []>} : vector<16x64xf32>, vector<64x128xf32>, vector<16x128xf32> -> vector<16x128xf32>
    %15 = arith.addf %10, %14 : vector<16x128xf32>
    %c0_11 = arith.constant 0 : index
    %c0_12 = arith.constant 0 : index
    %16 = vector.load %arg4[%c0_11, %c0_12] : memref<1x128xf32, #tpu.memory_space<vmem>>, vector<1x128xf32>
    %17 = vector.broadcast %16 : vector<1x128xf32> to vector<16x128xf32>
    %18 = arith.addf %15, %17 : vector<16x128xf32>
    %cst_13 = arith.constant 0.000000e+00 : f32
    %19 = vector.broadcast %cst_13 : f32 to vector<16x128xf32>
    %20 = arith.maximumf %18, %19 : vector<16x128xf32>
    %21 = vector.extract_strided_slice %20 {offsets = [0, 0], sizes = [15, 128], strides = [1, 1]} : vector<16x128xf32> to vector<15x128xf32>
    %22 = vector.extract_strided_slice %20 {offsets = [1, 0], sizes = [15, 128], strides = [1, 1]} : vector<16x128xf32> to vector<15x128xf32>
    %23 = arith.maximumf %21, %22 : vector<15x128xf32>
    %24 = vector.extract_strided_slice %23 {offsets = [0, 0], sizes = [15, 120], strides = [1, 1]} : vector<15x128xf32> to vector<15x120xf32>
    %25 = vector.extract_strided_slice %23 {offsets = [0, 8], sizes = [15, 120], strides = [1, 1]} : vector<15x128xf32> to vector<15x120xf32>
    %26 = arith.maximumf %24, %25 : vector<15x120xf32>
    %c0_14 = arith.constant 0 : index
    %c0_15 = arith.constant 0 : index
    %27 = vector.load %arg5[%c0_14, %c0_15] : memref<10x15xf32, #tpu.memory_space<vmem>>, vector<10x15xf32>
    %cst_16 = arith.constant dense<0.000000e+00> : vector<10x120xf32>
    %28 = tpu.matmul %27, %26, %cst_16 {dimension_numbers = #tpu.dot_dimension_numbers<[1], [0], [0], [1], [0, 0, 1, 1], [], []>} : vector<10x15xf32>, vector<15x120xf32>, vector<10x120xf32> -> vector<10x120xf32>
    %29 = vector.extract_strided_slice %28 {offsets = [0, 0], sizes = [8, 120], strides = [1, 1]} : vector<10x120xf32> to vector<8x120xf32>
    %c0_17 = arith.constant 0 : index
    %c0_18 = arith.constant 0 : index
    %c0_19 = arith.constant 0 : index
    %30 = vector.load %arg6[%c0_17, %c0_18, %c0_19] : memref<3x120x128xf32, #tpu.memory_space<vmem>>, vector<1x120x128xf32>
    %31 = vector.shape_cast %30 : vector<1x120x128xf32> to vector<120x128xf32>
    %cst_20 = arith.constant dense<0.000000e+00> : vector<8x128xf32>
    %32 = tpu.matmul %29, %31, %cst_20 {dimension_numbers = #tpu.dot_dimension_numbers<[1], [0], [0], [1], [0, 0, 1, 1], [], []>} : vector<8x120xf32>, vector<120x128xf32>, vector<8x128xf32> -> vector<8x128xf32>
    %33 = vector.extract_strided_slice %28 {offsets = [1, 0], sizes = [8, 120], strides = [1, 1]} : vector<10x120xf32> to vector<8x120xf32>
    %c1_21 = arith.constant 1 : index
    %c0_22 = arith.constant 0 : index
    %c0_23 = arith.constant 0 : index
    %34 = vector.load %arg6[%c1_21, %c0_22, %c0_23] : memref<3x120x128xf32, #tpu.memory_space<vmem>>, vector<1x120x128xf32>
    %35 = vector.shape_cast %34 : vector<1x120x128xf32> to vector<120x128xf32>
    %cst_24 = arith.constant dense<0.000000e+00> : vector<8x128xf32>
    %36 = tpu.matmul %33, %35, %cst_24 {dimension_numbers = #tpu.dot_dimension_numbers<[1], [0], [0], [1], [0, 0, 1, 1], [], []>} : vector<8x120xf32>, vector<120x128xf32>, vector<8x128xf32> -> vector<8x128xf32>
    %37 = arith.addf %32, %36 : vector<8x128xf32>
    %38 = vector.extract_strided_slice %28 {offsets = [2, 0], sizes = [8, 120], strides = [1, 1]} : vector<10x120xf32> to vector<8x120xf32>
    %c2_25 = arith.constant 2 : index
    %c0_26 = arith.constant 0 : index
    %c0_27 = arith.constant 0 : index
    %39 = vector.load %arg6[%c2_25, %c0_26, %c0_27] : memref<3x120x128xf32, #tpu.memory_space<vmem>>, vector<1x120x128xf32>
    %40 = vector.shape_cast %39 : vector<1x120x128xf32> to vector<120x128xf32>
    %cst_28 = arith.constant dense<0.000000e+00> : vector<8x128xf32>
    %41 = tpu.matmul %38, %40, %cst_28 {dimension_numbers = #tpu.dot_dimension_numbers<[1], [0], [0], [1], [0, 0, 1, 1], [], []>} : vector<8x120xf32>, vector<120x128xf32>, vector<8x128xf32> -> vector<8x128xf32>
    %42 = arith.addf %37, %41 : vector<8x128xf32>
    %c0_29 = arith.constant 0 : index
    %c0_30 = arith.constant 0 : index
    %43 = vector.load %arg7[%c0_29, %c0_30] : memref<1x128xf32, #tpu.memory_space<vmem>>, vector<1x128xf32>
    %44 = vector.broadcast %43 : vector<1x128xf32> to vector<8x128xf32>
    %45 = arith.addf %42, %44 : vector<8x128xf32>
    %cst_31 = arith.constant 0.000000e+00 : f32
    %46 = vector.broadcast %cst_31 : f32 to vector<8x128xf32>
    %47 = arith.maximumf %45, %46 : vector<8x128xf32>
    %48 = vector.extract_strided_slice %47 {offsets = [0, 0], sizes = [7, 128], strides = [1, 1]} : vector<8x128xf32> to vector<7x128xf32>
    %49 = vector.extract_strided_slice %47 {offsets = [1, 0], sizes = [7, 128], strides = [1, 1]} : vector<8x128xf32> to vector<7x128xf32>
    %50 = arith.maximumf %48, %49 : vector<7x128xf32>
    %51 = vector.extract_strided_slice %50 {offsets = [0, 0], sizes = [7, 112], strides = [1, 1]} : vector<7x128xf32> to vector<7x112xf32>
    %52 = vector.extract_strided_slice %50 {offsets = [0, 16], sizes = [7, 112], strides = [1, 1]} : vector<7x128xf32> to vector<7x112xf32>
    %53 = arith.maximumf %51, %52 : vector<7x112xf32>
    %c0_32 = arith.constant 0 : index
    %c0_33 = arith.constant 0 : index
    %54 = vector.load %arg8[%c0_32, %c0_33] : memref<6x7xf32, #tpu.memory_space<vmem>>, vector<6x7xf32>
    %cst_34 = arith.constant dense<0.000000e+00> : vector<6x112xf32>
    %55 = tpu.matmul %54, %53, %cst_34 {dimension_numbers = #tpu.dot_dimension_numbers<[1], [0], [0], [1], [0, 0, 1, 1], [], []>} : vector<6x7xf32>, vector<7x112xf32>, vector<6x112xf32> -> vector<6x112xf32>
    %56 = vector.extract_strided_slice %55 {offsets = [0, 0], sizes = [4, 112], strides = [1, 1]} : vector<6x112xf32> to vector<4x112xf32>
    %c0_35 = arith.constant 0 : index
    %c0_36 = arith.constant 0 : index
    %c0_37 = arith.constant 0 : index
    %57 = vector.load %arg9[%c0_35, %c0_36, %c0_37] : memref<3x112x128xf32, #tpu.memory_space<vmem>>, vector<1x112x128xf32>
    %58 = vector.shape_cast %57 : vector<1x112x128xf32> to vector<112x128xf32>
    %cst_38 = arith.constant dense<0.000000e+00> : vector<4x128xf32>
    %59 = tpu.matmul %56, %58, %cst_38 {dimension_numbers = #tpu.dot_dimension_numbers<[1], [0], [0], [1], [0, 0, 1, 1], [], []>} : vector<4x112xf32>, vector<112x128xf32>, vector<4x128xf32> -> vector<4x128xf32>
    %60 = vector.extract_strided_slice %55 {offsets = [1, 0], sizes = [4, 112], strides = [1, 1]} : vector<6x112xf32> to vector<4x112xf32>
    %c1_39 = arith.constant 1 : index
    %c0_40 = arith.constant 0 : index
    %c0_41 = arith.constant 0 : index
    %61 = vector.load %arg9[%c1_39, %c0_40, %c0_41] : memref<3x112x128xf32, #tpu.memory_space<vmem>>, vector<1x112x128xf32>
    %62 = vector.shape_cast %61 : vector<1x112x128xf32> to vector<112x128xf32>
    %cst_42 = arith.constant dense<0.000000e+00> : vector<4x128xf32>
    %63 = tpu.matmul %60, %62, %cst_42 {dimension_numbers = #tpu.dot_dimension_numbers<[1], [0], [0], [1], [0, 0, 1, 1], [], []>} : vector<4x112xf32>, vector<112x128xf32>, vector<4x128xf32> -> vector<4x128xf32>
    %64 = arith.addf %59, %63 : vector<4x128xf32>
    %65 = vector.extract_strided_slice %55 {offsets = [2, 0], sizes = [4, 112], strides = [1, 1]} : vector<6x112xf32> to vector<4x112xf32>
    %c2_43 = arith.constant 2 : index
    %c0_44 = arith.constant 0 : index
    %c0_45 = arith.constant 0 : index
    %66 = vector.load %arg9[%c2_43, %c0_44, %c0_45] : memref<3x112x128xf32, #tpu.memory_space<vmem>>, vector<1x112x128xf32>
    %67 = vector.shape_cast %66 : vector<1x112x128xf32> to vector<112x128xf32>
    %cst_46 = arith.constant dense<0.000000e+00> : vector<4x128xf32>
    %68 = tpu.matmul %65, %67, %cst_46 {dimension_numbers = #tpu.dot_dimension_numbers<[1], [0], [0], [1], [0, 0, 1, 1], [], []>} : vector<4x112xf32>, vector<112x128xf32>, vector<4x128xf32> -> vector<4x128xf32>
    %69 = arith.addf %64, %68 : vector<4x128xf32>
    %c0_47 = arith.constant 0 : index
    %c0_48 = arith.constant 0 : index
    %70 = vector.load %arg10[%c0_47, %c0_48] : memref<1x128xf32, #tpu.memory_space<vmem>>, vector<1x128xf32>
    %71 = vector.broadcast %70 : vector<1x128xf32> to vector<4x128xf32>
    %72 = arith.addf %69, %71 : vector<4x128xf32>
    %cst_49 = arith.constant 0.000000e+00 : f32
    %73 = vector.broadcast %cst_49 : f32 to vector<4x128xf32>
    %74 = arith.maximumf %72, %73 : vector<4x128xf32>
    %75 = vector.extract_strided_slice %74 {offsets = [0, 0], sizes = [3, 128], strides = [1, 1]} : vector<4x128xf32> to vector<3x128xf32>
    %76 = vector.extract_strided_slice %74 {offsets = [1, 0], sizes = [3, 128], strides = [1, 1]} : vector<4x128xf32> to vector<3x128xf32>
    %77 = arith.maximumf %75, %76 : vector<3x128xf32>
    %78 = vector.extract_strided_slice %77 {offsets = [0, 0], sizes = [3, 96], strides = [1, 1]} : vector<3x128xf32> to vector<3x96xf32>
    %79 = vector.extract_strided_slice %77 {offsets = [0, 32], sizes = [3, 96], strides = [1, 1]} : vector<3x128xf32> to vector<3x96xf32>
    %80 = arith.maximumf %78, %79 : vector<3x96xf32>
    %c0_50 = arith.constant 0 : index
    %c0_51 = arith.constant 0 : index
    %81 = vector.load %arg11[%c0_50, %c0_51] : memref<1x3xf32, #tpu.memory_space<vmem>>, vector<1x3xf32>
    %cst_52 = arith.constant dense<0.000000e+00> : vector<1x96xf32>
    %82 = tpu.matmul %81, %80, %cst_52 {dimension_numbers = #tpu.dot_dimension_numbers<[1], [0], [0], [1], [0, 0, 1, 1], [], []>} : vector<1x3xf32>, vector<3x96xf32>, vector<1x96xf32> -> vector<1x96xf32>
    %c0_53 = arith.constant 0 : index
    %c0_54 = arith.constant 0 : index
    %83 = vector.load %arg12[%c0_53, %c0_54] : memref<96x32xf32, #tpu.memory_space<vmem>>, vector<96x32xf32>
    %cst_55 = arith.constant dense<0.000000e+00> : vector<1x32xf32>
    %84 = tpu.matmul %82, %83, %cst_55 {dimension_numbers = #tpu.dot_dimension_numbers<[1], [0], [0], [1], [0, 0, 1, 1], [], []>} : vector<1x96xf32>, vector<96x32xf32>, vector<1x32xf32> -> vector<1x32xf32>
    %c0_56 = arith.constant 0 : index
    %c0_57 = arith.constant 0 : index
    %85 = vector.load %arg13[%c0_56, %c0_57] : memref<32x32xf32, #tpu.memory_space<vmem>>, vector<32x32xf32>
    %cst_58 = arith.constant dense<0.000000e+00> : vector<1x32xf32>
    %86 = tpu.matmul %84, %85, %cst_58 {dimension_numbers = #tpu.dot_dimension_numbers<[1], [0], [0], [1], [0, 0, 1, 1], [], []>} : vector<1x32xf32>, vector<32x32xf32>, vector<1x32xf32> -> vector<1x32xf32>
    %c0_59 = arith.constant 0 : index
    %c0_60 = arith.constant 0 : index
    %87 = vector.load %arg14[%c0_59, %c0_60] : memref<1x32xf32, #tpu.memory_space<vmem>>, vector<1x32xf32>
    %88 = arith.addf %86, %87 : vector<1x32xf32>
    %c0_61 = arith.constant 0 : index
    %c0_62 = arith.constant 0 : index
    %c0_63 = arith.constant 0 : index
    %89 = vector.load %arg2[%c0_61, %c0_62, %c0_63] : memref<1x1x16xf32, #tpu.memory_space<vmem>>, vector<1x1x16xf32>
    %90 = vector.shape_cast %89 : vector<1x1x16xf32> to vector<1x16xf32>
    %c0_64 = arith.constant 0 : index
    %c0_65 = arith.constant 0 : index
    %91 = vector.load %arg15[%c0_64, %c0_65] : memref<16x32xf32, #tpu.memory_space<vmem>>, vector<16x32xf32>
    %cst_66 = arith.constant dense<0.000000e+00> : vector<1x32xf32>
    %92 = tpu.matmul %90, %91, %cst_66 {dimension_numbers = #tpu.dot_dimension_numbers<[1], [0], [0], [1], [0, 0, 1, 1], [], []>} : vector<1x16xf32>, vector<16x32xf32>, vector<1x32xf32> -> vector<1x32xf32>
    %c0_67 = arith.constant 0 : index
    %c0_68 = arith.constant 0 : index
    %93 = vector.load %arg16[%c0_67, %c0_68] : memref<1x32xf32, #tpu.memory_space<vmem>>, vector<1x32xf32>
    %94 = arith.addf %92, %93 : vector<1x32xf32>
    %cst_69 = arith.constant 0.000000e+00 : f32
    %95 = vector.broadcast %cst_69 : f32 to vector<1x32xf32>
    %96 = arith.maximumf %94, %95 : vector<1x32xf32>
    %c0_70 = arith.constant 0 : index
    %c0_71 = arith.constant 0 : index
    %97 = vector.load %arg17[%c0_70, %c0_71] : memref<32x32xf32, #tpu.memory_space<vmem>>, vector<32x32xf32>
    %cst_72 = arith.constant dense<0.000000e+00> : vector<1x32xf32>
    %98 = tpu.matmul %96, %97, %cst_72 {dimension_numbers = #tpu.dot_dimension_numbers<[1], [0], [0], [1], [0, 0, 1, 1], [], []>} : vector<1x32xf32>, vector<32x32xf32>, vector<1x32xf32> -> vector<1x32xf32>
    %c0_73 = arith.constant 0 : index
    %c0_74 = arith.constant 0 : index
    %99 = vector.load %arg18[%c0_73, %c0_74] : memref<1x32xf32, #tpu.memory_space<vmem>>, vector<1x32xf32>
    %100 = arith.addf %98, %99 : vector<1x32xf32>
    %cst_75 = arith.constant 0.000000e+00 : f32
    %101 = vector.broadcast %cst_75 : f32 to vector<1x32xf32>
    %102 = arith.maximumf %100, %101 : vector<1x32xf32>
    %c0_76 = arith.constant 0 : index
    %c0_77 = arith.constant 0 : index
    %103 = vector.load %arg19[%c0_76, %c0_77] : memref<32x32xf32, #tpu.memory_space<vmem>>, vector<32x32xf32>
    %cst_78 = arith.constant dense<0.000000e+00> : vector<1x32xf32>
    %104 = tpu.matmul %102, %103, %cst_78 {dimension_numbers = #tpu.dot_dimension_numbers<[1], [0], [0], [1], [0, 0, 1, 1], [], []>} : vector<1x32xf32>, vector<32x32xf32>, vector<1x32xf32> -> vector<1x32xf32>
    %c0_79 = arith.constant 0 : index
    %c0_80 = arith.constant 0 : index
    %105 = vector.load %arg20[%c0_79, %c0_80] : memref<1x32xf32, #tpu.memory_space<vmem>>, vector<1x32xf32>
    %106 = arith.addf %104, %105 : vector<1x32xf32>
    %c0_81 = arith.constant 0 : index
    %c0_82 = arith.constant 0 : index
    %107 = vector.load %arg21[%c0_81, %c0_82] : memref<32x32xf32, #tpu.memory_space<vmem>>, vector<32x32xf32>
    %cst_83 = arith.constant dense<0.000000e+00> : vector<1x32xf32>
    %108 = tpu.matmul %106, %107, %cst_83 {dimension_numbers = #tpu.dot_dimension_numbers<[1], [0], [0], [1], [0, 0, 1, 1], [], []>} : vector<1x32xf32>, vector<32x32xf32>, vector<1x32xf32> -> vector<1x32xf32>
    %c0_84 = arith.constant 0 : index
    %c0_85 = arith.constant 0 : index
    %109 = vector.load %arg22[%c0_84, %c0_85] : memref<1x32xf32, #tpu.memory_space<vmem>>, vector<1x32xf32>
    %110 = arith.addf %108, %109 : vector<1x32xf32>
    %c0_86 = arith.constant 0 : index
    %c0_87 = arith.constant 0 : index
    %111 = vector.load %arg23[%c0_86, %c0_87] : memref<32x64xf32, #tpu.memory_space<vmem>>, vector<32x64xf32>
    %cst_88 = arith.constant dense<0.000000e+00> : vector<1x64xf32>
    %112 = tpu.matmul %88, %111, %cst_88 {dimension_numbers = #tpu.dot_dimension_numbers<[1], [0], [0], [1], [0, 0, 1, 1], [], []>} : vector<1x32xf32>, vector<32x64xf32>, vector<1x64xf32> -> vector<1x64xf32>
    %c0_89 = arith.constant 0 : index
    %c0_90 = arith.constant 0 : index
    %113 = vector.load %arg24[%c0_89, %c0_90] : memref<32x64xf32, #tpu.memory_space<vmem>>, vector<32x64xf32>
    %cst_91 = arith.constant dense<0.000000e+00> : vector<1x64xf32>
    %114 = tpu.matmul %110, %113, %cst_91 {dimension_numbers = #tpu.dot_dimension_numbers<[1], [0], [0], [1], [0, 0, 1, 1], [], []>} : vector<1x32xf32>, vector<32x64xf32>, vector<1x64xf32> -> vector<1x64xf32>
    %115 = arith.addf %112, %114 : vector<1x64xf32>
    %c0_92 = arith.constant 0 : index
    %c0_93 = arith.constant 0 : index
    %116 = vector.load %arg25[%c0_92, %c0_93] : memref<1x64xf32, #tpu.memory_space<vmem>>, vector<1x64xf32>
    %117 = arith.addf %115, %116 : vector<1x64xf32>
    %cst_94 = arith.constant 0.000000e+00 : f32
    %118 = vector.broadcast %cst_94 : f32 to vector<1x64xf32>
    %119 = arith.maximumf %117, %118 : vector<1x64xf32>
    %c0_95 = arith.constant 0 : index
    %c0_96 = arith.constant 0 : index
    %120 = vector.load %arg26[%c0_95, %c0_96] : memref<64x64xf32, #tpu.memory_space<vmem>>, vector<64x64xf32>
    %cst_97 = arith.constant dense<0.000000e+00> : vector<1x64xf32>
    %121 = tpu.matmul %119, %120, %cst_97 {dimension_numbers = #tpu.dot_dimension_numbers<[1], [0], [0], [1], [0, 0, 1, 1], [], []>} : vector<1x64xf32>, vector<64x64xf32>, vector<1x64xf32> -> vector<1x64xf32>
    %c0_98 = arith.constant 0 : index
    %c0_99 = arith.constant 0 : index
    %122 = vector.load %arg27[%c0_98, %c0_99] : memref<1x64xf32, #tpu.memory_space<vmem>>, vector<1x64xf32>
    %123 = arith.addf %121, %122 : vector<1x64xf32>
    %cst_100 = arith.constant 0.000000e+00 : f32
    %124 = vector.broadcast %cst_100 : f32 to vector<1x64xf32>
    %125 = arith.maximumf %123, %124 : vector<1x64xf32>
    %c0_101 = arith.constant 0 : index
    %c0_102 = arith.constant 0 : index
    %126 = vector.load %arg28[%c0_101, %c0_102] : memref<64x10xf32, #tpu.memory_space<vmem>>, vector<64x10xf32>
    %cst_103 = arith.constant dense<0.000000e+00> : vector<1x10xf32>
    %127 = tpu.matmul %125, %126, %cst_103 {dimension_numbers = #tpu.dot_dimension_numbers<[1], [0], [0], [1], [0, 0, 1, 1], [], []>} : vector<1x64xf32>, vector<64x10xf32>, vector<1x10xf32> -> vector<1x10xf32>
    %c0_104 = arith.constant 0 : index
    %c0_105 = arith.constant 0 : index
    %128 = vector.load %arg29[%c0_104, %c0_105] : memref<1x10xf32, #tpu.memory_space<vmem>>, vector<1x10xf32>
    %129 = arith.addf %127, %128 : vector<1x10xf32>
    %cst_106 = arith.constant dense<0xFF800000> : vector<1xf32>
    %130 = vector.multi_reduction <maximumf>, %129, %cst_106 [1] : vector<1x10xf32> to vector<1xf32>
    %131 = vector.shape_cast %130 : vector<1xf32> to vector<1x1xf32>
    %132 = vector.broadcast %131 : vector<1x1xf32> to vector<1x10xf32>
    %133 = arith.subf %129, %132 : vector<1x10xf32>
    %134 = math.exp %133 : vector<1x10xf32>
    %cst_107 = arith.constant dense<0.000000e+00> : vector<1xf32>
    %135 = vector.multi_reduction <add>, %134, %cst_107 [1] : vector<1x10xf32> to vector<1xf32>
    %136 = vector.shape_cast %135 : vector<1xf32> to vector<1x1xf32>
    %137 = vector.broadcast %136 : vector<1x1xf32> to vector<1x10xf32>
    %138 = arith.divf %134, %137 : vector<1x10xf32>
    %c0_108 = arith.constant 0 : index
    %c0_109 = arith.constant 0 : index
    %c0_110 = arith.constant 0 : index
    %139 = vector.load %arg30[%c0_108, %c0_109, %c0_110] : memref<1x1x10xf32, #tpu.memory_space<vmem>>, vector<1x1x10xf32>
    %140 = vector.shape_cast %139 : vector<1x1x10xf32> to vector<1x10xf32>
    %141 = vector.shape_cast %138 : vector<1x10xf32> to vector<1x1x10xf32>
    tpu.vector_store %arg30[%c0_108, %c0_109, %c0_110], %141 {strides = array<i32>} : memref<1x1x10xf32, #tpu.memory_space<vmem>>, vector<1x1x10xf32>,
    return
  }
  func.func @transform_0(%arg0: i32) -> (i32, i32, i32) {
    %c0_i32 = arith.constant 0 : i32
    %c0_i32_0 = arith.constant 0 : i32
    %c0_i32_1 = arith.constant 0 : i32
    return %arg0, %c0_i32, %c0_i32_0 : i32, i32, i32
  }
  func.func @transform_1(%arg0: i32) -> (i32, i32, i32) {
    %c0_i32 = arith.constant 0 : i32
    %c0_i32_0 = arith.constant 0 : i32
    %c0_i32_1 = arith.constant 0 : i32
    return %arg0, %c0_i32, %c0_i32_0 : i32, i32, i32
  }
  func.func @transform_2(%arg0: i32) -> (i32, i32, i32) {
    %c0_i32 = arith.constant 0 : i32
    %c0_i32_0 = arith.constant 0 : i32
    %c0_i32_1 = arith.constant 0 : i32
    %c0_i32_2 = arith.constant 0 : i32
    return %c0_i32, %c0_i32_0, %c0_i32_1 : i32, i32, i32
  }
  func.func @transform_3(%arg0: i32) -> (i32, i32) {
    %c0_i32 = arith.constant 0 : i32
    %c0_i32_0 = arith.constant 0 : i32
    %c0_i32_1 = arith.constant 0 : i32
    return %c0_i32, %c0_i32_0 : i32, i32
  }
  func.func @transform_4(%arg0: i32) -> (i32, i32) {
    %c0_i32 = arith.constant 0 : i32
    %c0_i32_0 = arith.constant 0 : i32
    %c0_i32_1 = arith.constant 0 : i32
    return %c0_i32, %c0_i32_0 : i32, i32
  }
  func.func @transform_5(%arg0: i32) -> (i32, i32, i32) {
    %c0_i32 = arith.constant 0 : i32
    %c0_i32_0 = arith.constant 0 : i32
    %c0_i32_1 = arith.constant 0 : i32
    %c0_i32_2 = arith.constant 0 : i32
    return %c0_i32, %c0_i32_0, %c0_i32_1 : i32, i32, i32
  }
  func.func @transform_6(%arg0: i32) -> (i32, i32) {
    %c0_i32 = arith.constant 0 : i32
    %c0_i32_0 = arith.constant 0 : i32
    %c0_i32_1 = arith.constant 0 : i32
    return %c0_i32, %c0_i32_0 : i32, i32
  }
  func.func @transform_7(%arg0: i32) -> (i32, i32) {
    %c0_i32 = arith.constant 0 : i32
    %c0_i32_0 = arith.constant 0 : i32
    %c0_i32_1 = arith.constant 0 : i32
    return %c0_i32, %c0_i32_0 : i32, i32
  }
  func.func @transform_8(%arg0: i32) -> (i32, i32, i32) {
    %c0_i32 = arith.constant 0 : i32
    %c0_i32_0 = arith.constant 0 : i32
    %c0_i32_1 = arith.constant 0 : i32
    %c0_i32_2 = arith.constant 0 : i32
    return %c0_i32, %c0_i32_0, %c0_i32_1 : i32, i32, i32
  }
  func.func @transform_9(%arg0: i32) -> (i32, i32) {
    %c0_i32 = arith.constant 0 : i32
    %c0_i32_0 = arith.constant 0 : i32
    %c0_i32_1 = arith.constant 0 : i32
    return %c0_i32, %c0_i32_0 : i32, i32
  }
  func.func @transform_10(%arg0: i32) -> (i32, i32) {
    %c0_i32 = arith.constant 0 : i32
    %c0_i32_0 = arith.constant 0 : i32
    %c0_i32_1 = arith.constant 0 : i32
    return %c0_i32, %c0_i32_0 : i32, i32
  }
  func.func @transform_11(%arg0: i32) -> (i32, i32) {
    %c0_i32 = arith.constant 0 : i32
    %c0_i32_0 = arith.constant 0 : i32
    %c0_i32_1 = arith.constant 0 : i32
    return %c0_i32, %c0_i32_0 : i32, i32
  }
  func.func @transform_12(%arg0: i32) -> (i32, i32) {
    %c0_i32 = arith.constant 0 : i32
    %c0_i32_0 = arith.constant 0 : i32
    %c0_i32_1 = arith.constant 0 : i32
    return %c0_i32, %c0_i32_0 : i32, i32
  }
  func.func @transform_13(%arg0: i32) -> (i32, i32) {
    %c0_i32 = arith.constant 0 : i32
    %c0_i32_0 = arith.constant 0 : i32
    %c0_i32_1 = arith.constant 0 : i32
    return %c0_i32, %c0_i32_0 : i32, i32
  }
  func.func @transform_14(%arg0: i32) -> (i32, i32) {
    %c0_i32 = arith.constant 0 : i32
    %c0_i32_0 = arith.constant 0 : i32
    %c0_i32_1 = arith.constant 0 : i32
    return %c0_i32, %c0_i32_0 : i32, i32
  }
  func.func @transform_15(%arg0: i32) -> (i32, i32) {
    %c0_i32 = arith.constant 0 : i32
    %c0_i32_0 = arith.constant 0 : i32
    %c0_i32_1 = arith.constant 0 : i32
    return %c0_i32, %c0_i32_0 : i32, i32
  }
  func.func @transform_16(%arg0: i32) -> (i32, i32) {
    %c0_i32 = arith.constant 0 : i32
    %c0_i32_0 = arith.constant 0 : i32
    %c0_i32_1 = arith.constant 0 : i32
    return %c0_i32, %c0_i32_0 : i32, i32
  }
  func.func @transform_17(%arg0: i32) -> (i32, i32) {
    %c0_i32 = arith.constant 0 : i32
    %c0_i32_0 = arith.constant 0 : i32
    %c0_i32_1 = arith.constant 0 : i32
    return %c0_i32, %c0_i32_0 : i32, i32
  }
  func.func @transform_18(%arg0: i32) -> (i32, i32) {
    %c0_i32 = arith.constant 0 : i32
    %c0_i32_0 = arith.constant 0 : i32
    %c0_i32_1 = arith.constant 0 : i32
    return %c0_i32, %c0_i32_0 : i32, i32
  }
  func.func @transform_19(%arg0: i32) -> (i32, i32) {
    %c0_i32 = arith.constant 0 : i32
    %c0_i32_0 = arith.constant 0 : i32
    %c0_i32_1 = arith.constant 0 : i32
    return %c0_i32, %c0_i32_0 : i32, i32
  }
  func.func @transform_20(%arg0: i32) -> (i32, i32) {
    %c0_i32 = arith.constant 0 : i32
    %c0_i32_0 = arith.constant 0 : i32
    %c0_i32_1 = arith.constant 0 : i32
    return %c0_i32, %c0_i32_0 : i32, i32
  }
  func.func @transform_21(%arg0: i32) -> (i32, i32) {
    %c0_i32 = arith.constant 0 : i32
    %c0_i32_0 = arith.constant 0 : i32
    %c0_i32_1 = arith.constant 0 : i32
    return %c0_i32, %c0_i32_0 : i32, i32
  }
  func.func @transform_22(%arg0: i32) -> (i32, i32) {
    %c0_i32 = arith.constant 0 : i32
    %c0_i32_0 = arith.constant 0 : i32
    %c0_i32_1 = arith.constant 0 : i32
    return %c0_i32, %c0_i32_0 : i32, i32
  }
  func.func @transform_23(%arg0: i32) -> (i32, i32) {
    %c0_i32 = arith.constant 0 : i32
    %c0_i32_0 = arith.constant 0 : i32
    %c0_i32_1 = arith.constant 0 : i32
    return %c0_i32, %c0_i32_0 : i32, i32
  }
  func.func @transform_24(%arg0: i32) -> (i32, i32) {
    %c0_i32 = arith.constant 0 : i32
    %c0_i32_0 = arith.constant 0 : i32
    %c0_i32_1 = arith.constant 0 : i32
    return %c0_i32, %c0_i32_0 : i32, i32
  }
  func.func @transform_25(%arg0: i32) -> (i32, i32) {
    %c0_i32 = arith.constant 0 : i32
    %c0_i32_0 = arith.constant 0 : i32
    %c0_i32_1 = arith.constant 0 : i32
    return %c0_i32, %c0_i32_0 : i32, i32
  }
  func.func @transform_26(%arg0: i32) -> (i32, i32) {
    %c0_i32 = arith.constant 0 : i32
    %c0_i32_0 = arith.constant 0 : i32
    %c0_i32_1 = arith.constant 0 : i32
    return %c0_i32, %c0_i32_0 : i32, i32
  }
  func.func @transform_27(%arg0: i32) -> (i32, i32) {
    %c0_i32 = arith.constant 0 : i32
    %c0_i32_0 = arith.constant 0 : i32
    %c0_i32_1 = arith.constant 0 : i32
    return %c0_i32, %c0_i32_0 : i32, i32
  }
  func.func @transform_28(%arg0: i32) -> (i32, i32) {
    %c0_i32 = arith.constant 0 : i32
    %c0_i32_0 = arith.constant 0 : i32
    %c0_i32_1 = arith.constant 0 : i32
    return %c0_i32, %c0_i32_0 : i32, i32
  }
  func.func @transform_29(%arg0: i32) -> (i32, i32, i32) {
    %c0_i32 = arith.constant 0 : i32
    %c0_i32_0 = arith.constant 0 : i32
    %c0_i32_1 = arith.constant 0 : i32
    return %arg0, %c0_i32, %c0_i32_0 : i32, i32, i32
  }
}

</mosaic_0001>

<bundles_post_ra>
// kernel: _lambda_.1
= control target key start
LH: loop header
LB: loop body
LE: loop exit
PB: predicated region body
PF: predicated region fallthrough
CT: control target
= control target key end

     0   :  { %s3422_s6 = smov 1   ;;  %s3423_s10 = smov 2   ;;  %s4171_s0 = inlined_call_operand.smem [shape: u32[30], index: -1, kind: input, shape index: {}] }
   0x1   :  { %s3482_s5 = sld [smem:[%s4171_s0]]   ;;  %s3424_s14 = smov 3  }
   0x2   :  { %s3487_s9 = sld [smem:[%s4171_s0 + %s3422_s6]]   ;;  %s3425_s18 = smov 4  }
   0x3   :  { %s3492_s13 = sld [smem:[%s4171_s0 + %s3423_s10]]   ;;  %s3426_s22 = smov 5  }
   0x4   :  { %s3497_s17 = sld [smem:[%s4171_s0 + %s3424_s14]]   ;;  %s3427_s26 = smov 6  }
   0x5   :  { %s3502_s21 = sld [smem:[%s4171_s0 + %s3425_s18]]   ;;  %s3428_s30 = smov 7  }
   0x6   :  { %s3507_s25 = sld [smem:[%s4171_s0 + %s3426_s22]]   ;;  %s3429_s4 = smov 8  }
   0x7   :  { %4194 = sst [smem:[#allocation44_spill]] %s3482_s5  ;;  %s3430_s10 = smov 9  }
   0x8   :  { %4195 = sst [smem:[#allocation45_spill]] %s3487_s9  ;;  %s3431_s15 = smov 10  }
   0x9   :  { %4196 = sst [smem:[#allocation46_spill]] %s3492_s13  ;;  %s3432_s20 = smov 11  }
   0xa   :  { %s3512_s29 = sld [smem:[%s4171_s0 + %s3427_s26]]   ;;  %s3433_s26 = smov 12  }
   0xb   :  { %s3517_s3 = sld [smem:[%s4171_s0 + %s3428_s30]]   ;;  %s3434_s1 = smov 13  }
   0xc   :  { %4197 = sst [smem:[#allocation47_spill]] %s3507_s25  ;;  %s3435_s7 = smov 14  }
   0xd   :  { %s3522_s8 = sld [smem:[%s4171_s0 + %s3429_s4]]   ;;  %s3437_s22 = smov 16  }
   0xe   :  { %s3527_s14 = sld [smem:[%s4171_s0 + %s3430_s10]]   ;;  %s3438_s28 = smov 17  }
   0xf   :  { %s3532_s19 = sld [smem:[%s4171_s0 + %s3431_s15]]   ;;  %s3436_s15 = smov 15  }
  0x10   :  { %s3537_s24 = sld [smem:[%s4171_s0 + %s3432_s20]]  }
  0x11   :  { %4198 = sst [smem:[#allocation48_spill]] %s3517_s3 }
  0x12   :  { %s3542_s30 = sld [smem:[%s4171_s0 + %s3433_s26]]  }
  0x13   :  { %4199 = sst [smem:[#allocation49_spill]] %s3522_s8 }
  0x14   :  { %s3547_s6 = sld [smem:[%s4171_s0 + %s3434_s1]]  }
  0x15   :  { %s3552_s12 = sld [smem:[%s4171_s0 + %s3435_s7]]   ;;  %s3439_s7 = smov 18  }
  0x16   :  { %s3557_s20 = sld [smem:[%s4171_s0 + %s3436_s15]]   ;;  %s3440_s15 = smov 19  }
  0x17   :  { %s3562_s27 = sld [smem:[%s4171_s0 + %s3437_s22]]   ;;  %s3441_s22 = smov 20  }
  0x18   :  { %s3567_s4 = sld [smem:[%s4171_s0 + %s3438_s28]]   ;;  %s3442_s28 = smov 21  }
  0x19   :  { %s3572_s8 = sld [smem:[%s4171_s0 + %s3439_s7]]   ;;  %s3443_s7 = smov 22  }
  0x1a   :  { %4200 = sst [smem:[#allocation50_spill]] %s3547_s6 }
  0x1b   :  { %4201 = sst [smem:[#allocation51_spill]] %s3552_s12 }
  0x1c   :  { %4202 = sst [smem:[#allocation52_spill]] %s3557_s20 }
  0x1d   :  { %4203 = sst [smem:[#allocation53_spill]] %s3562_s27 }
  0x1e   :  { %4204 = sst [smem:[#allocation54_spill]] %s3567_s4 }
  0x1f   :  { %4205 = sst [smem:[#allocation55_spill]] %s3572_s8 }
  0x20   :  { %s3577_s20 = sld [smem:[%s4171_s0 + %s3440_s15]]   ;;  %s3444_s15 = smov 23  }
  0x21   :  { %s3582_s25 = sld [smem:[%s4171_s0 + %s3441_s22]]   ;;  %s3445_s22 = smov 24  }
  0x22   :  { %s3587_s4 = sld [smem:[%s4171_s0 + %s3442_s28]]   ;;  %s3446_s28 = smov 25  }
  0x23   :  { %s3592_s5 = sld [smem:[%s4171_s0 + %s3443_s7]]   ;;  %s3447_s7 = smov 26  }
  0x24   :  { %s3602_s9 = sld [smem:[%s4171_s0 + %s3445_s22]]   ;;  %s3449_s22 = smov 28  }
  0x26   :  { %4206 = sst [smem:[#allocation56_spill]] %s3577_s20 }
  0x27   :  { %4207 = sst [smem:[#allocation57_spill]] %s3582_s25 }
  0x28   :  { %4208 = sst [smem:[#allocation58_spill]] %s3587_s4 }
  0x29   :  { %4209 = sst [smem:[#allocation59_spill]] %s3592_s5 }
  0x2a   :  { %s3597_s20 = sld [smem:[%s4171_s0 + %s3444_s15]]   ;;  %s3448_s15 = smov 27  }
  0x2b   :  { %4211 = sst [smem:[#allocation61_spill]] %s3602_s9 }
  0x2c   :  { %s3607_s4 = sld [smem:[%s4171_s0 + %s3446_s28]]   ;;  %s3450_s28 = smov 29  }
  0x2d   :  { %s3612_s25 = sld [smem:[%s4171_s0 + %s3447_s7]]  }
  0x2e   :  { %s3622_s9 = sld [smem:[%s4171_s0 + %s3449_s22]]  }
  0x2f   :  { %s3627_s27 = sld [smem:[%s4171_s0 + %s3450_s28]]  }
  0x30   :  { %4210 = sst [smem:[#allocation60_spill]] %s3597_s20 }
  0x31   :  { %s3617_s20 = sld [smem:[%s4171_s0 + %s3448_s15]]  }
  0x32   :  { %4212 = sst [smem:[#allocation62_spill]] %s3607_s4 }
  0x33   :  { %4213 = sst [smem:[#allocation63_spill]] %s3612_s25 }
  0x34   :  { %4214 = sst [smem:[#allocation64_spill]] %s3622_s9 }
  0x35   :  { %4215 = sst [smem:[#allocation65_spill]] %s3627_s27 }
  0x36   :  { %64 = vsyncpa [#allocation3], 0 }
  0x37   :  { %66 = vsyncpa [#allocation3 + $0x1], 0 }
  0x38   :  { %67 = vsyncpa [#allocation6], 0 }
  0x39   :  { %68 = vsyncpa [#allocation9], 0 }
  0x3a   :  { %69 = vsyncpa [#allocation12], 0 }
  0x3b   :  { %70 = vsyncpa [#allocation15], 0 }
  0x3c   :  { %71 = vsyncpa [#allocation18], 0 }
  0x3d   :  { %72 = vsyncpa [#allocation21], 0 }
  0x3e   :  { %73 = vsyncpa [#allocation24], 0 }
  0x3f   :  { %74 = vsyncpa [#allocation27], 0 }
  0x40   :  { %75 = vsyncpa [#allocation30], 0 }
  0x41   :  { %76 = vsyncpa [#allocation4], 0 }
  0x42   :  { %78 = vsyncpa [#allocation4 + $0x1], 0  ;;  %s3629_s7 = smov 0   ;;  %s3631_s10 = smov 0  }
  0x43   :  { %s3633_s11 = smov 0   ;;  %s3635_s0 = smov 0  }
  0x44 LB: > { %s4216_s12 = sld [smem:[#allocation51_spill]]  ;;  %s3653_s16 = sadd.s32 4294967295, %s3420_s0   ;;  %s3416_s11 = sphi %s3633_s11, %s4273_s11   ;;  %s3412_s10 = sphi %s3631_s10, %s4272_s10   ;;  %s3408_s7 = sphi %s3629_s7, %s4271_s7   ;;  %s3420_s0 = sphi %s3635_s0, %s4274_s0  }
  0x45   : > { %s4217_s8 = sld [smem:[#allocation55_spill]]  ;;  %p2350_p0 = scmp.ge.s32.totalorder %s3420_s0, 1 }
  0x46   : > { %s4218_s6 = sld [smem:[#allocation50_spill]]  ;;  %p4193_p1 = scmp.eq.s32.totalorder %s3653_s16, 0 }
  0x47   : > { %s4219_s5 = sld [smem:[#allocation59_spill]]  ;;  %p734_p2 = scmp.lt.s32.totalorder %s3420_s0, 3 }
  0x48   : > { %s4220_s4 = sld [smem:[#allocation62_spill]]  ;;  %s3451_s22 = smov [#allocation5]  }
  0x49   : > { %s4221_s3 = sld [smem:[#allocation48_spill]]  ;;  %p3658_p3 = pnand %p2350_p0, %p734_p2 }
  0x4a   : > { %s4222_s13 = sld [smem:[#allocation46_spill]]  ;;  %s3662_s23 = sshll.u32 %s3451_s22, 4  ;;  %s748_s23 = int_to_ptr.vmem [resolvable:$true] %s3662_s23 }
  0x4b   : > { %4223 = sst [smem:[#allocation66_spill]] %s3653_s16  ;;  %p2556_p4 = pneg %p3658_p3 }
  0x4c   : > { %s4224_s18 = scalar_select %p3658_p3, 1, 0 }
  0x4d   : > { %s771_s26 = sshll.u32 %s3502_s21, 4  ;;  %p3671_p6 = pnand %p2556_p4, %p4193_p1  ;;  %s3675_s26 = int_to_ptr.hbm [resolvable:$true] %s771_s26 }
  0x4e   : > { %4225 = sst [smem:[#allocation67_spill]] %s4224_s18  ;;  %s3452_s2 = smov [#allocation8]  }
  0x4f   : > { %s801_s1 = sshll.u32 %s4221_s3, 4  ;;  %s3678_s22 = sshll.u32 %s3452_s2, 4  ;;  %s774_s22 = int_to_ptr.vmem [resolvable:$true] %s3678_s22  ;;  %s3698_s1 = int_to_ptr.hbm [resolvable:$true] %s801_s1 }
  0x50   : > { %s745_s15 = sshll.u32 %s4222_s13, 4  ;;  %p3683_p8 = pneg %p3671_p6  ;;  %s3650_s15 = int_to_ptr.hbm [resolvable:$true] %s745_s15 }
  0x51   : > { %s2748_s27 = sshra.s32 %s3650_s15, 4  ;;  %s2755_s18 = scalar_lea.hbm %s4222_s13, 192  ;;  %s2749_s27 = int_to_ptr.hbm [resolvable:$true] %s2748_s27 }
  0x52   : > { %s2750_s9 = scalar_lea.hbm %s2749_s27, 192  ;;  %p2756_p11 = scmp.lt.s32.totalorder %s2749_s27, %s4222_s13 }
  0x53   : > { %p2751_p7 = scmp.ne.s32.totalorder %s2749_s27, %s2750_s9  ;;  %p2757_p12 = scmp.lt.s32.totalorder %s2755_s18, %s2750_s9 }
  0x55   : > { %p2753_p9 = pnand %p3683_p8, %p2751_p7  ;;  %p2758_p13 = por %p2757_p12, %p2756_p11 }
  0x57   : > { %p2754_p10 = pneg %p2753_p9 }
  0x59   : > { %p2759_p0 = pnand %p2758_p13, %p2754_p10 }
  0x5b   : > { %2762 = shalt.err (!%p2759_p0)
}
  0x5c   : > { %s4185_s2 = smov 128   ;;  %s3454_s16 = smov 8  }
  0x5d   : > { %2559 = dma.hbm_to_vmem [thread:$0]  (!%p3671_p6), %s3650_s15, 3072, %s748_s23, [#allocation6], %s4185_s2, %s4185_s2, %s3454_s16  }
  0x5e   : > { %s2778_s9 = sshra.s32 %s3675_s26, 4  ;;  %s2785_s18 = scalar_lea.hbm %s3502_s21, 16  ;;  %s2779_s9 = int_to_ptr.hbm [resolvable:$true] %s2778_s9 }
  0x5f   : > { %s2780_s27 = scalar_lea.hbm %s2779_s9, 16  ;;  %p2786_p9 = scmp.lt.s32.totalorder %s2779_s9, %s3502_s21 }
  0x60   : > { %p2781_p2 = scmp.ne.s32.totalorder %s2779_s9, %s2780_s27  ;;  %p2787_p10 = scmp.lt.s32.totalorder %s2785_s18, %s2780_s27 }
  0x62   : > { %p2783_p4 = pnand %p2781_p2, %p3683_p8  ;;  %p2788_p11 = por %p2787_p10, %p2786_p9 }
  0x64   : > { %p2784_p7 = pneg %p2783_p4 }
  0x66   : > { %p2789_p12 = pnand %p2788_p11, %p2784_p7 }
  0x68   : > { %2792 = shalt.err (!%p2789_p12)
}
  0x69   : > { %2565 = dma.hbm_to_vmem [thread:$0]  (!%p3671_p6), %s3675_s26, 256, %s774_s22, [#allocation9], %s4185_s2, %s4185_s2, %s3454_s16  }
  0x6a   : > { %s828_s15 = sshll.u32 %s3532_s19, 4  ;;  %s3455_s23 = smov [#allocation11]   ;;  %s3712_s15 = int_to_ptr.hbm [resolvable:$true] %s828_s15 }
  0x6b   : > { %s803_s13 = sshll.u32 %s3455_s23, 4  ;;  %s2808_s9 = sshra.s32 %s3698_s1, 4  ;;  %s804_s13 = int_to_ptr.vmem [resolvable:$true] %s803_s13  ;;  %s2809_s9 = int_to_ptr.hbm [resolvable:$true] %s2808_s9 }
  0x6c   : > { %s2810_s27 = scalar_lea.hbm %s2809_s9, 8  ;;  %s2815_s18 = scalar_lea.hbm %s4221_s3, 8 }
  0x6d   : > { %p2811_p13 = scmp.ne.s32.totalorder %s2809_s9, %s2810_s27  ;;  %p2816_p4 = scmp.lt.s32.totalorder %s2809_s9, %s4221_s3 }
  0x6e   : > { %p2817_p7 = scmp.lt.s32.totalorder %s2815_s18, %s2810_s27 }
  0x6f   : > { %p2813_p0 = pnand %p2811_p13, %p3683_p8 }
  0x70   : > { %p2818_p9 = por %p2817_p7, %p2816_p4 }
  0x71   : > { %p2814_p2 = pneg %p2813_p0 }
  0x73   : > { %p2819_p10 = pnand %p2818_p9, %p2814_p2 }
  0x75   : > { %2822 = shalt.err (!%p2819_p10)
}
  0x76   : > { %2571 = dma.hbm_to_vmem [thread:$0]  (!%p3671_p6), %s3698_s1, 128, %s804_s13, [#allocation12]  }
  0x77   : > { %s3456_s26 = smov [#allocation14]   ;;  %s853_s23 = sshll.u32 %s3542_s30, 4  ;;  %s3723_s23 = int_to_ptr.hbm [resolvable:$true] %s853_s23 }
  0x78   : > { %s830_s22 = sshll.u32 %s3456_s26, 4  ;;  %s2838_s9 = sshra.s32 %s3712_s15, 4  ;;  %s831_s22 = int_to_ptr.vmem [resolvable:$true] %s830_s22  ;;  %s2839_s9 = int_to_ptr.hbm [resolvable:$true] %s2838_s9 }
  0x79   : > { %s2840_s27 = scalar_lea.hbm %s2839_s9, 1  ;;  %s2845_s18 = scalar_lea.hbm %s3532_s19, 1 }
  0x7a   : > { %p2841_p11 = scmp.ne.s32.totalorder %s2839_s9, %s2840_s27  ;;  %p2846_p0 = scmp.lt.s32.totalorder %s2839_s9, %s3532_s19 }
  0x7b   : > { %p2847_p2 = scmp.lt.s32.totalorder %s2845_s18, %s2840_s27 }
  0x7c   : > { %p2843_p12 = pnand %p2841_p11, %p3683_p8 }
  0x7d   : > { %p2848_p4 = por %p2847_p2, %p2846_p0 }
  0x7e   : > { %p2844_p13 = pneg %p2843_p12 }
  0x80   : > { %p2849_p7 = pnand %p2848_p4, %p2844_p13 }
  0x82   : > { %2852 = shalt.err (!%p2849_p7)
}
  0x83   : > { %2577 = dma.hbm_to_vmem [thread:$0]  (!%p3671_p6), %s3712_s15, 16, %s831_s22, [#allocation15]  }
  0x84   : > { %s879_s13 = sshll.u32 %s4216_s12, 4  ;;  %s3457_s1 = smov [#allocation17]   ;;  %s3734_s13 = int_to_ptr.hbm [resolvable:$true] %s879_s13 }
  0x85   : > { %s855_s26 = sshll.u32 %s3457_s1, 4  ;;  %s2868_s9 = sshra.s32 %s3723_s23, 4  ;;  %s856_s26 = int_to_ptr.vmem [resolvable:$true] %s855_s26  ;;  %s2869_s9 = int_to_ptr.hbm [resolvable:$true] %s2868_s9 }
  0x86   : > { %s2870_s27 = scalar_lea.hbm %s2869_s9, 32  ;;  %s2875_s18 = scalar_lea.hbm %s3542_s30, 32 }
  0x87   : > { %p2871_p9 = scmp.ne.s32.totalorder %s2869_s9, %s2870_s27  ;;  %p2876_p12 = scmp.lt.s32.totalorder %s2869_s9, %s3542_s30 }
  0x88   : > { %p2877_p13 = scmp.lt.s32.totalorder %s2875_s18, %s2870_s27 }
  0x89   : > { %p2873_p10 = pnand %p2871_p9, %p3683_p8 }
  0x8a   : > { %p2878_p0 = por %p2877_p13, %p2876_p12 }
  0x8b   : > { %p2874_p11 = pneg %p2873_p10 }
  0x8d   : > { %p2879_p2 = pnand %p2878_p0, %p2874_p11 }
  0x8f   : > { %2882 = shalt.err (!%p2879_p2)
}
  0x90   : > { %2583 = dma.hbm_to_vmem [thread:$0]  (!%p3671_p6), %s3723_s23, 512, %s856_s26, [#allocation18], %s4185_s2, %s4185_s2, %s3454_s16  }
  0x91   : > { %s3458_s15 = smov [#allocation20]   ;;  %s913_s1 = sshll.u32 %s4217_s8, 4  ;;  %s3748_s1 = int_to_ptr.hbm [resolvable:$true] %s913_s1 }
  0x92   : > { %s881_s22 = sshll.u32 %s3458_s15, 4  ;;  %s2898_s9 = sshra.s32 %s3734_s13, 4  ;;  %s882_s22 = int_to_ptr.vmem [resolvable:$true] %s881_s22  ;;  %s2899_s9 = int_to_ptr.hbm [resolvable:$true] %s2898_s9 }
  0x93   : > { %s2900_s27 = scalar_lea.hbm %s2899_s9, 16  ;;  %s2905_s18 = scalar_lea.hbm %s4216_s12, 16 }
  0x94   : > { %p2901_p4 = scmp.ne.s32.totalorder %s2899_s9, %s2900_s27  ;;  %p2906_p10 = scmp.lt.s32.totalorder %s2899_s9, %s4216_s12 }
  0x95   : > { %p2907_p11 = scmp.lt.s32.totalorder %s2905_s18, %s2900_s27 }
  0x96   : > { %p2903_p7 = pnand %p2901_p4, %p3683_p8 }
  0x97   : > { %p2908_p12 = por %p2907_p11, %p2906_p10 }
  0x98   : > { %p2904_p9 = pneg %p2903_p7 }
  0x9a   : > { %p2909_p13 = pnand %p2908_p12, %p2904_p9 }
  0x9c   : > { %2912 = shalt.err (!%p2909_p13)
}
  0x9d   : > { %2589 = dma.hbm_to_vmem [thread:$0]  (!%p3671_p6), %s3734_s13, 256, %s882_s22, [#allocation21], %s4185_s2, %s4185_s2, %s3454_s16  }
  0x9e   : > { %s947_s23 = sshll.u32 %s4219_s5, 4  ;;  %s3459_s26 = smov [#allocation23]   ;;  %s3762_s23 = int_to_ptr.hbm [resolvable:$true] %s947_s23 }
  0x9f   : > { %s915_s15 = sshll.u32 %s3459_s26, 4  ;;  %s2928_s9 = sshra.s32 %s3748_s1, 4  ;;  %s916_s15 = int_to_ptr.vmem [resolvable:$true] %s915_s15  ;;  %s2929_s9 = int_to_ptr.hbm [resolvable:$true] %s2928_s9 }
  0xa0   : > { %s2930_s27 = scalar_lea.hbm %s2929_s9, 32  ;;  %s2935_s18 = scalar_lea.hbm %s4217_s8, 32 }
  0xa1   : > { %p2931_p0 = scmp.ne.s32.totalorder %s2929_s9, %s2930_s27  ;;  %p2936_p7 = scmp.lt.s32.totalorder %s2929_s9, %s4217_s8 }
  0xa2   : > { %p2937_p9 = scmp.lt.s32.totalorder %s2935_s18, %s2930_s27 }
  0xa3   : > { %p2933_p2 = pnand %p2931_p0, %p3683_p8 }
  0xa4   : > { %p2938_p10 = por %p2937_p9, %p2936_p7 }
  0xa5   : > { %p2934_p4 = pneg %p2933_p2 }
  0xa7   : > { %p2939_p11 = pnand %p2938_p10, %p2934_p4 }
  0xa9   : > { %2942 = shalt.err (!%p2939_p11)
}
  0xaa   : > { %2595 = dma.hbm_to_vmem [thread:$0]  (!%p3671_p6), %s3748_s1, 512, %s916_s15, [#allocation24], %s4185_s2, %s4185_s2, %s3454_s16  }
  0xab   : > { %s3460_s13 = smov [#allocation26]   ;;  %s978_s26 = sshll.u32 %s4220_s4, 4  ;;  %s3776_s26 = int_to_ptr.hbm [resolvable:$true] %s978_s26 }
  0xac   : > { %s949_s22 = sshll.u32 %s3460_s13, 4  ;;  %s2958_s9 = sshra.s32 %s3762_s23, 4  ;;  %s950_s22 = int_to_ptr.vmem [resolvable:$true] %s949_s22  ;;  %s2959_s9 = int_to_ptr.hbm [resolvable:$true] %s2958_s9 }
  0xad   : > { %s2960_s27 = scalar_lea.hbm %s2959_s9, 32  ;;  %s2965_s18 = scalar_lea.hbm %s4219_s5, 32 }
  0xae   : > { %p2961_p12 = scmp.ne.s32.totalorder %s2959_s9, %s2960_s27  ;;  %p2966_p2 = scmp.lt.s32.totalorder %s2959_s9, %s4219_s5 }
  0xaf   : > { %p2967_p4 = scmp.lt.s32.totalorder %s2965_s18, %s2960_s27 }
  0xb0   : > { %p2963_p13 = pnand %p2961_p12, %p3683_p8 }
  0xb1   : > { %p2968_p7 = por %p2967_p4, %p2966_p2 }
  0xb2   : > { %p2964_p0 = pneg %p2963_p13 }
  0xb4   : > { %p2969_p9 = pnand %p2968_p7, %p2964_p0 }
  0xb6   : > { %2972 = shalt.err (!%p2969_p9)
}
  0xb7   : > { %2601 = dma.hbm_to_vmem [thread:$0]  (!%p3671_p6), %s3762_s23, 512, %s950_s22, [#allocation27], %s4185_s2, %s4185_s2, %s3454_s16  }
  0xb8   : > { %s760_s1 = sshll.u32 %s3497_s17, 4  ;;  %s3461_s15 = smov [#allocation29]   ;;  %s3790_s1 = int_to_ptr.hbm [resolvable:$true] %s760_s1 }
  0xb9   : > { %s980_s13 = sshll.u32 %s3461_s15, 4  ;;  %s2988_s9 = sshra.s32 %s3776_s26, 4  ;;  %s981_s13 = int_to_ptr.vmem [resolvable:$true] %s980_s13  ;;  %s2989_s9 = int_to_ptr.hbm [resolvable:$true] %s2988_s9 }
  0xba   : > { %s2990_s27 = scalar_lea.hbm %s2989_s9, 64  ;;  %s2995_s18 = scalar_lea.hbm %s4220_s4, 64 }
  0xbb   : > { %p2991_p10 = scmp.ne.s32.totalorder %s2989_s9, %s2990_s27  ;;  %p2996_p13 = scmp.lt.s32.totalorder %s2989_s9, %s4220_s4 }
  0xbc   : > { %p2997_p0 = scmp.lt.s32.totalorder %s2995_s18, %s2990_s27 }
  0xbd   : > { %p2993_p11 = pnand %p2991_p10, %p3683_p8 }
  0xbe   : > { %p2998_p2 = por %p2997_p0, %p2996_p13 }
  0xbf   : > { %p2994_p12 = pneg %p2993_p11 }
  0xc1   : > { %p2999_p4 = pnand %p2998_p2, %p2994_p12 }
  0xc3   : > { %3002 = shalt.err (!%p2999_p4)
}
  0xc4   : > { %2607 = dma.hbm_to_vmem [thread:$0]  (!%p3671_p6), %s3776_s26, 1024, %s981_s13, [#allocation30], %s4185_s2, %s4185_s2, %s3454_s16  }
  0xc5   : > { %s3462_s23 = smov [#allocation7]   ;;  %s789_s15 = sshll.u32 %s3512_s29, 4  ;;  %s3804_s15 = int_to_ptr.hbm [resolvable:$true] %s789_s15 }
  0xc6   : > { %s762_s22 = sshll.u32 %s3462_s23, 4  ;;  %s3018_s9 = sshra.s32 %s3790_s1, 4  ;;  %s763_s22 = int_to_ptr.vmem [resolvable:$true] %s762_s22  ;;  %s3019_s9 = int_to_ptr.hbm [resolvable:$true] %s3018_s9 }
  0xc7   : > { %s3020_s27 = scalar_lea.hbm %s3019_s9, 1  ;;  %s3025_s18 = scalar_lea.hbm %s3497_s17, 1 }
  0xc8   : > { %p3021_p7 = scmp.ne.s32.totalorder %s3019_s9, %s3020_s27  ;;  %p3026_p11 = scmp.lt.s32.totalorder %s3019_s9, %s3497_s17 }
  0xc9   : > { %p3027_p12 = scmp.lt.s32.totalorder %s3025_s18, %s3020_s27 }
  0xca   : > { %p3023_p9 = pnand %p3021_p7, %p3683_p8 }
  0xcb   : > { %p3028_p13 = por %p3027_p12, %p3026_p11 }
  0xcc   : > { %p3024_p10 = pneg %p3023_p9 }
  0xce   : > { %p3029_p0 = pnand %p3028_p13, %p3024_p10 }
  0xd0   : > { %3032 = shalt.err (!%p3029_p0)
}
  0xd1   : > { %2562 = dma.hbm_to_vmem [thread:$0]  (!%p3671_p6), %s3790_s1, 16, %s763_s22, [#allocation6]  }
  0xd2   : > { %s816_s26 = sshll.u32 %s3527_s14, 4  ;;  %s3463_s13 = smov [#allocation10]   ;;  %s3815_s26 = int_to_ptr.hbm [resolvable:$true] %s816_s26 }
  0xd3   : > { %s791_s23 = sshll.u32 %s3463_s13, 4  ;;  %s3048_s9 = sshra.s32 %s3804_s15, 4  ;;  %s792_s23 = int_to_ptr.vmem [resolvable:$true] %s791_s23  ;;  %s3049_s9 = int_to_ptr.hbm [resolvable:$true] %s3048_s9 }
  0xd4   : > { %s3050_s27 = scalar_lea.hbm %s3049_s9, 1  ;;  %s3055_s18 = scalar_lea.hbm %s3512_s29, 1 }
  0xd5   : > { %p3051_p2 = scmp.ne.s32.totalorder %s3049_s9, %s3050_s27  ;;  %p3056_p9 = scmp.lt.s32.totalorder %s3049_s9, %s3512_s29 }
  0xd6   : > { %p3057_p10 = scmp.lt.s32.totalorder %s3055_s18, %s3050_s27 }
  0xd7   : > { %p3053_p4 = pnand %p3051_p2, %p3683_p8 }
  0xd8   : > { %p3058_p11 = por %p3057_p10, %p3056_p9 }
  0xd9   : > { %p3054_p7 = pneg %p3053_p4 }
  0xdb   : > { %p3059_p12 = pnand %p3058_p11, %p3054_p7 }
  0xdd   : > { %3062 = shalt.err (!%p3059_p12)
}
  0xde   : > { %2568 = dma.hbm_to_vmem [thread:$0]  (!%p3671_p6), %s3804_s15, 16, %s792_s23, [#allocation9]  }
  0xdf   : > { %s3464_s1 = smov [#allocation13]   ;;  %s839_s13 = sshll.u32 %s3537_s24, 4  ;;  %s3826_s13 = int_to_ptr.hbm [resolvable:$true] %s839_s13 }
  0xe0   : > { %s818_s22 = sshll.u32 %s3464_s1, 4  ;;  %s3078_s9 = sshra.s32 %s3815_s26, 4  ;;  %s819_s22 = int_to_ptr.vmem [resolvable:$true] %s818_s22  ;;  %s3079_s9 = int_to_ptr.hbm [resolvable:$true] %s3078_s9 }
  0xe1   : > { %s3080_s27 = scalar_lea.hbm %s3079_s9, 1  ;;  %s3085_s18 = scalar_lea.hbm %s3527_s14, 1 }
  0xe2   : > { %p3081_p13 = scmp.ne.s32.totalorder %s3079_s9, %s3080_s27  ;;  %p3086_p4 = scmp.lt.s32.totalorder %s3079_s9, %s3527_s14 }
  0xe3   : > { %p3087_p7 = scmp.lt.s32.totalorder %s3085_s18, %s3080_s27 }
  0xe4   : > { %p3083_p0 = pnand %p3081_p13, %p3683_p8 }
  0xe5   : > { %p3088_p9 = por %p3087_p7, %p3086_p4 }
  0xe6   : > { %p3084_p2 = pneg %p3083_p0 }
  0xe8   : > { %p3089_p10 = pnand %p3088_p9, %p3084_p2 }
  0xea   : > { %3092 = shalt.err (!%p3089_p10)
}
  0xeb   : > { %2574 = dma.hbm_to_vmem [thread:$0]  (!%p3671_p6), %s3815_s26, 16, %s819_s22, [#allocation12]  }
  0xec   : > { %s868_s15 = sshll.u32 %s4218_s6, 4  ;;  %s3465_s23 = smov [#allocation16]   ;;  %s3837_s15 = int_to_ptr.hbm [resolvable:$true] %s868_s15 }
  0xed   : > { %s841_s1 = sshll.u32 %s3465_s23, 4  ;;  %s3108_s9 = sshra.s32 %s3826_s13, 4  ;;  %s842_s1 = int_to_ptr.vmem [resolvable:$true] %s841_s1  ;;  %s3109_s9 = int_to_ptr.hbm [resolvable:$true] %s3108_s9 }
  0xee   : > { %s3110_s27 = scalar_lea.hbm %s3109_s9, 96  ;;  %s3115_s18 = scalar_lea.hbm %s3537_s24, 96 }
  0xef   : > { %p3111_p11 = scmp.ne.s32.totalorder %s3109_s9, %s3110_s27  ;;  %p3116_p0 = scmp.lt.s32.totalorder %s3109_s9, %s3537_s24 }
  0xf0   : > { %p3117_p2 = scmp.lt.s32.totalorder %s3115_s18, %s3110_s27 }
  0xf1   : > { %p3113_p12 = pnand %p3111_p11, %p3683_p8 }
  0xf2   : > { %p3118_p4 = por %p3117_p2, %p3116_p0 }
  0xf3   : > { %p3114_p13 = pneg %p3113_p12 }
  0xf5   : > { %p3119_p7 = pnand %p3118_p4, %p3114_p13 }
  0xf7   : > { %3122 = shalt.err (!%p3119_p7)
}
  0xf8   : > { %s4228_s26 = sld [smem:[#allocation53_spill]]  ;;  %s3466_s22 = smov [#allocation19]  }
  0xf9   : > { %2580 = dma.hbm_to_vmem [thread:$0]  (!%p3671_p6), %s3826_s13, 1536, %s842_s1, [#allocation15], %s4185_s2, %s4185_s2, %s3454_s16  }
  0xfa   : > { %s870_s23 = sshll.u32 %s3466_s22, 4  ;;  %s3138_s9 = sshra.s32 %s3837_s15, 4  ;;  %s871_s23 = int_to_ptr.vmem [resolvable:$true] %s870_s23  ;;  %s3139_s9 = int_to_ptr.hbm [resolvable:$true] %s3138_s9 }
  0xfb   : > { %s3140_s27 = scalar_lea.hbm %s3139_s9, 1  ;;  %s3145_s18 = scalar_lea.hbm %s4218_s6, 1 }
  0xfc   : > { %p3141_p9 = scmp.ne.s32.totalorder %s3139_s9, %s3140_s27  ;;  %p3146_p12 = scmp.lt.s32.totalorder %s3139_s9, %s4218_s6 }
  0xfd   : > { %p3147_p13 = scmp.lt.s32.totalorder %s3145_s18, %s3140_s27 }
  0xfe   : > { %s896_s3 = sshll.u32 %s4228_s26, 4  ;;  %p3143_p10 = pnand %p3141_p9, %p3683_p8  ;;  %s3851_s3 = int_to_ptr.hbm [resolvable:$true] %s896_s3 }
  0xff   : > { %p3148_p0 = por %p3147_p13, %p3146_p12 }
 0x100   : > { %p3144_p11 = pneg %p3143_p10 }
 0x102   : > { %p3149_p2 = pnand %p3148_p0, %p3144_p11 }
 0x104   : > { %3152 = shalt.err (!%p3149_p2)
}
 0x105   : > { %s4229_s13 = sld [smem:[#allocation57_spill]]  ;;  %s3467_s22 = smov [#allocation22]  }
 0x106   : > { %2586 = dma.hbm_to_vmem [thread:$0]  (!%p3671_p6), %s3837_s15, 16, %s871_s23, [#allocation18]  }
 0x107   : > { %s898_s2 = sshll.u32 %s3467_s22, 4  ;;  %s3168_s9 = sshra.s32 %s3851_s3, 4  ;;  %s899_s2 = int_to_ptr.vmem [resolvable:$true] %s898_s2  ;;  %s3169_s9 = int_to_ptr.hbm [resolvable:$true] %s3168_s9 }
 0x108   : > { %s3170_s27 = scalar_lea.hbm %s3169_s9, 32  ;;  %s3175_s18 = scalar_lea.hbm %s4228_s26, 32 }
 0x109   : > { %p3171_p4 = scmp.ne.s32.totalorder %s3169_s9, %s3170_s27  ;;  %p3176_p10 = scmp.lt.s32.totalorder %s3169_s9, %s4228_s26 }
 0x10a   : > { %p3177_p11 = scmp.lt.s32.totalorder %s3175_s18, %s3170_s27 }
 0x10b   : > { %s930_s1 = sshll.u32 %s4229_s13, 4  ;;  %p3173_p7 = pnand %p3171_p4, %p3683_p8  ;;  %s3862_s1 = int_to_ptr.hbm [resolvable:$true] %s930_s1 }
 0x10c   : > { %p3178_p12 = por %p3177_p11, %p3176_p10 }
 0x10d   : > { %p3174_p9 = pneg %p3173_p7 }
 0x10f   : > { %p3179_p13 = pnand %p3178_p12, %p3174_p9 }
 0x111   : > { %3182 = shalt.err (!%p3179_p13)
}
 0x112   : > { %s4230_s15 = smov 128   ;;  %s4231_s23 = sld [smem:[#allocation60_spill]] }
 0x113   : > { %2592 = dma.hbm_to_vmem [thread:$0]  (!%p3671_p6), %s3851_s3, 512, %s899_s2, [#allocation21], %s4230_s15, %s4230_s15, %s3454_s16  }
 0x114   : > { %s3468_s22 = smov [#allocation25]   ;;  %s3198_s9 = sshra.s32 %s3862_s1, 4  ;;  %s3199_s9 = int_to_ptr.hbm [resolvable:$true] %s3198_s9 }
 0x115   : > { %s932_s4 = sshll.u32 %s3468_s22, 4  ;;  %s3200_s27 = scalar_lea.hbm %s3199_s9, 32  ;;  %s933_s4 = int_to_ptr.vmem [resolvable:$true] %s932_s4 }
 0x116   : > { %p3201_p0 = scmp.ne.s32.totalorder %s3199_s9, %s3200_s27  ;;  %s3205_s18 = scalar_lea.hbm %s4229_s13, 32 }
 0x117   : > { %p3206_p7 = scmp.lt.s32.totalorder %s3199_s9, %s4229_s13  ;;  %p3207_p9 = scmp.lt.s32.totalorder %s3205_s18, %s3200_s27 }
 0x118   : > { %s961_s5 = sshll.u32 %s4231_s23, 4  ;;  %p3203_p2 = pnand %p3201_p0, %p3683_p8  ;;  %s3876_s5 = int_to_ptr.hbm [resolvable:$true] %s961_s5 }
 0x119   : > { %p3208_p10 = por %p3207_p9, %p3206_p7 }
 0x11a   : > { %p3204_p4 = pneg %p3203_p2 }
 0x11c   : > { %p3209_p11 = pnand %p3208_p10, %p3204_p4 }
 0x11e   : > { %3212 = shalt.err (!%p3209_p11)
}
 0x11f   : > { %2598 = dma.hbm_to_vmem [thread:$0]  (!%p3671_p6), %s3862_s1, 512, %s933_s4, [#allocation24], %s4230_s15, %s4230_s15, %s3454_s16  }
 0x120   : > { %s995_s3 = sshll.u32 %s3617_s20, 4  ;;  %s3469_s2 = smov [#allocation28]   ;;  %s3890_s3 = int_to_ptr.hbm [resolvable:$true] %s995_s3 }
 0x121   : > { %s963_s22 = sshll.u32 %s3469_s2, 4  ;;  %s3228_s9 = sshra.s32 %s3876_s5, 4  ;;  %s964_s22 = int_to_ptr.vmem [resolvable:$true] %s963_s22  ;;  %s3229_s9 = int_to_ptr.hbm [resolvable:$true] %s3228_s9 }
 0x122   : > { %s3230_s27 = scalar_lea.hbm %s3229_s9, 32  ;;  %s3235_s18 = scalar_lea.hbm %s4231_s23, 32 }
 0x123   : > { %p3231_p12 = scmp.ne.s32.totalorder %s3229_s9, %s3230_s27  ;;  %p3236_p2 = scmp.lt.s32.totalorder %s3229_s9, %s4231_s23 }
 0x124   : > { %p3237_p4 = scmp.lt.s32.totalorder %s3235_s18, %s3230_s27 }
 0x125   : > { %p3233_p13 = pnand %p3231_p12, %p3683_p8 }
 0x126   : > { %p3238_p7 = por %p3237_p4, %p3236_p2 }
 0x127   : > { %p3234_p0 = pneg %p3233_p13 }
 0x129   : > { %p3239_p9 = pnand %p3238_p7, %p3234_p0 }
 0x12b   : > { %3242 = shalt.err (!%p3239_p9)
}
 0x12c   : > { %2604 = dma.hbm_to_vmem [thread:$0]  (!%p3671_p6), %s3876_s5, 512, %s964_s22, [#allocation27], %s4230_s15, %s4230_s15, %s3454_s16  }
 0x12d   : > { %s3470_s4 = smov [#allocation31]   ;;  %s3258_s2 = sshra.s32 %s3890_s3, 4  ;;  %s3259_s2 = int_to_ptr.hbm [resolvable:$true] %s3258_s2 }
 0x12e   : > { %s997_s1 = sshll.u32 %s3470_s4, 4  ;;  %s3260_s9 = scalar_lea.hbm %s3259_s2, 64  ;;  %s998_s1 = int_to_ptr.vmem [resolvable:$true] %s997_s1 }
 0x12f   : > { %p3261_p10 = scmp.ne.s32.totalorder %s3259_s2, %s3260_s9  ;;  %s3265_s27 = scalar_lea.hbm %s3617_s20, 64 }
 0x130   : > { %p3266_p13 = scmp.lt.s32.totalorder %s3259_s2, %s3617_s20  ;;  %p3267_p0 = scmp.lt.s32.totalorder %s3265_s27, %s3260_s9 }
 0x131   : > { %p3263_p11 = pnand %p3261_p10, %p3683_p8 }
 0x132   : > { %p3268_p2 = por %p3267_p0, %p3266_p13 }
 0x133   : > { %p3264_p12 = pneg %p3263_p11 }
 0x135   : > { %p3269_p4 = pnand %p3268_p2, %p3264_p12 }
 0x137   : > { %3272 = shalt.err (!%p3269_p4)
}
 0x138   : > { %s4232_s5 = sld [smem:[#allocation66_spill]]  ;;  %s2349_s25 = sadd.s32 4294967294, %s3420_s0  }
 0x139   : > { %2610 = dma.hbm_to_vmem [thread:$0]  (!%p3671_p6), %s3890_s3, 1024, %s998_s1, [#allocation30], %s4230_s15, %s4230_s15, %s3454_s16  }
 0x13a   : > { %s3916_s28 = sadd.s32 1, %s3420_s0   ;;  %s4233_s22 = sld [smem:[#allocation45_spill]] }
 0x13b   : > { %s114_s18 = ssub.s32 %s3420_s0, %s3916_s28  ;;  %s117_s4 = sadd.s32 1, %s3416_s11 }
 0x13c   : > { %p115_p8 = scmp.eq.s32.totalorder %s114_s18, 0  ;;  %p124_p7 = scmp.ne.s32.totalorder %s3416_s11, %s3412_s10 }
 0x13d   : > { %p125_p9 = scmp.eq.s32.totalorder %s3420_s0, 0  ;;  %p130_p10 = scmp.ne.s32.totalorder %s3412_s10, %s3408_s7 }
 0x13e   : > { %s3927_s2 = scalar_select %p115_p8, %s3416_s11, %s117_s4  }
 0x13f   : > { %p3929_p11 = por %p125_p9, %p124_p7  ;;  %p3935_p6 = por %p4193_p1, %p130_p10 }
 0x140   : > { %p721_p12 = scmp.eq.s32.totalorder %s4232_s5, 1  ;;  %p727_p13 = scmp.eq.s32.totalorder %s2349_s25, 1 }
 0x141   : > { %p2637_p0 = scmp.lt.s32.totalorder %s3420_s0, 2  ;;  %s1022_s15 = sand.u32 1, %s3416_s11  }
 0x142   : > { %p3942_p2 = por %p721_p12, %p124_p7  ;;  %p3946_p4 = por %p727_p13, %p130_p10 }
 0x143   : > { %s1028_s27 = scalar_lea.hbm %s4233_s22, %s3420_s0  ;;  %s1025_s18 = scalar_lea.vmem [#allocation2], %s1022_s15 }
 0x144   : > { %s4237_s1 = scalar_select %p3946_p4, 1, 0 }
 0x145   : > { %s1032_s4 = sshll.u32 %s1025_s18, 4  ;;  %s1030_s6 = sshll.u32 %s1028_s27, 4  ;;  %s1033_s4 = int_to_ptr.vmem [resolvable:$true] %s1032_s4  ;;  %s1031_s6 = int_to_ptr.hbm [resolvable:$true] %s1030_s6 }
 0x146   : > { %p3954_p8 = pnand %p2637_p0, %p3929_p11  ;;  %s1023_s25 = scalar_lea.sflag [#allocation3], %s1022_s15 }
 0x147   : > { %s3288_s8 = sshra.s32 %s1031_s6, 4  ;;  %s3295_s13 = scalar_lea.hbm %s4233_s22, 2  ;;  %s3289_s8 = int_to_ptr.hbm [resolvable:$true] %s3288_s8 }
 0x148   : > { %s3290_s12 = scalar_lea.hbm %s3289_s8, 1  ;;  %p3292_p9 = pneg %p3954_p8 }
 0x149   : > { %p3291_p7 = scmp.ne.s32.totalorder %s3289_s8, %s3290_s12  ;;  %p3296_p13 = scmp.lt.s32.totalorder %s3289_s8, %s4233_s22 }
 0x14a   : > { %p3297_p5 = scmp.lt.s32.totalorder %s3295_s13, %s3290_s12 }
 0x14b   : > { %p3293_p10 = pnand %p3292_p9, %p3291_p7 }
 0x14c   : > { %p3298_p1 = por %p3297_p5, %p3296_p13 }
 0x14d   : > { %p3294_p12 = pneg %p3293_p10 }
 0x14f   : > { %p3299_p4 = pnand %p3298_p1, %p3294_p12 }
 0x151   : > { %3302 = shalt.err (!%p3299_p4)
}
 0x152   : > { %2614 = dma.hbm_to_vmem [thread:$0]  (!%p3954_p8), %s1031_s6, 16, %s1033_s4, %s1023_s25  }
 0x153   : > { %1041 = sbr.rel (%p3658_p3) target bundleno = 2804 (0xaf4), region = 136  ;;  %s3967_s15 = sand.u32 (!%p3658_p3), 1, %s3412_s10  }
 0x154   : > { %s1044_s27 = scalar_lea.sflag (!%p3658_p3), [#allocation3], %s3967_s15  ;;  %s1046_s18 = scalar_lea.vmem (!%p3658_p3), [#allocation2], %s3967_s15 }
 0x158   : > { %3363 = dma.done.wait (%p3935_p6), %s1044_s27, 16  }
 0x159   : > { %3365 = vsyncadd (%p3935_p6), %s1044_s27, 4294967280  ;;  %s4240_s8 = sld [smem:[#allocation66_spill]] }
 0x15f   : > { %p4241_p1 = scmp.eq.s32.totalorder %s4240_s8, 0 }
 0x161   : > { %3367 = dma.done.wait (%p4241_p1), [#allocation6], 3088   ;;  %p4242_p5 = pmov %p4241_p1 }
 0x162   : > { %p4243_p3 = pmov %p4241_p1 }
 0x163   : > { %3369 = vsyncadd (%p4242_p5), [#allocation6], 4294964208 }
 0x164   : > { %3371 = dma.done.wait (%p4243_p3), [#allocation9], 272   ;;  %p4244_p11 = pmov %p4241_p1 }
 0x165   : > { %p4245_p0 = pmov %p4241_p1 }
 0x166   : > { %3373 = vsyncadd (%p4244_p11), [#allocation9], 4294967024 }
 0x167   : > { %3375 = dma.done.wait (%p4245_p0), [#allocation12], 144   ;;  %p4246_p4 = pmov %p4245_p0 }
 0x168   : > { %p4247_p6 = pmov %p4245_p0 }
 0x169   : > { %3377 = vsyncadd (%p4246_p4), [#allocation12], 4294967152 }
 0x16a   : > { %3379 = dma.done.wait (%p4247_p6), [#allocation15], 1552   ;;  %p4248_p8 = pmov %p4245_p0 }
 0x16b   : > { %p4249_p7 = pmov %p4245_p0 }
 0x16c   : > { %3381 = vsyncadd (%p4248_p8), [#allocation15], 4294965744 }
 0x16d   : > { %3383 = dma.done.wait (%p4249_p7), [#allocation18], 528   ;;  %p4250_p9 = pmov %p4245_p0 }
 0x16e   : > { %p4251_p10 = pmov %p4245_p0 }
 0x16f   : > { %3385 = vsyncadd (%p4250_p9), [#allocation18], 4294966768 }
 0x170   : > { %3387 = dma.done.wait (%p4251_p10), [#allocation21], 768   ;;  %p4252_p12 = pmov %p4245_p0 }
 0x171   : > { %p4253_p13 = pmov %p4245_p0 }
 0x172   : > { %3389 = vsyncadd (%p4252_p12), [#allocation21], 4294966528 }
 0x173   : > { %3391 = dma.done.wait (%p4253_p13), [#allocation24], 1024   ;;  %p4254_p1 = pmov %p4245_p0 }
 0x174   : > { %p4255_p5 = pmov %p4245_p0 }
 0x175   : > { %3393 = vsyncadd (%p4254_p1), [#allocation24], 4294966272 }
 0x176   : > { %3395 = dma.done.wait (%p4255_p5), [#allocation27], 1024   ;;  %p4256_p3 = pmov %p4245_p0 }
 0x177   : > { %p4257_p11 = pmov %p4245_p0 }
 0x178   : > { %3397 = vsyncadd (%p4256_p3), [#allocation27], 4294966272 }
 0x179   : > { %3399 = dma.done.wait (%p4257_p11), [#allocation30], 2048  }
 0x17a   : > { %3401 = vsyncadd (%p4245_p0), [#allocation30], 4294965248  ;;  %p1215_p4 = scmp.lt.s32.totalorder %s4240_s8, 1  ;;  %s4258_s12 = sld [smem:[#allocation44_spill]]  ;;  %v1312_v0 = vld [vmem:[#allocation5 + $0xb8] sm:$0xff]  ;;  %v1311_v1 = vld [vmem:[#allocation5 + $0xb0] sm:$0xff] }
 0x17b   : > { %v1239_v2 = vld [vmem:[#allocation5 + $0x78] sm:$0xff]  ;;  %1331 = vmatpush.msra.mxu2 %v1312_v0  ;;  %v1238_v4 = vld [vmem:[#allocation5 + $0x70] sm:$0xff]  ;;  %v1310_v5 = vld [vmem:[#allocation5 + $0xa8] sm:$0xff]  ;;  %vm1313_vm0 = vcmask 1045504   ;;  %vm1243_vm1 = vcmask 1046528   ;;  %vm1249_vm2 = vcmask 523264  }
 0x17c   : > { %s1216_s6 = scalar_select %p1215_p4, %s4240_s8, 1  ;;  %1262 = vmatpush.msra.mxu0 %v1239_v2  ;;  %v1230_v3 = vld [vmem:[#allocation5 + $0x38] sm:$0xff]  ;;  %v1229_v6 = vld [vmem:[#allocation5 + $0x30] sm:$0xff]  ;;  %v1237_v7 = vld [vmem:[#allocation5 + $0x68] sm:$0xff]  ;;  %vm1377_vm3 = vcmask 121856   ;;  %vm1446_vm4 = vcmask 982016  }
 0x17d   : > { %1289 = vmatpush.msra.mxu1 %v1230_v3  ;;  %1332 = vmatpush.msra.mxu2 %v1311_v1  ;;  %v1228_v8 = vld [vmem:[#allocation5 + $0x28] sm:$0xff]  ;;  %v1309_v9 = vld [vmem:[#allocation5 + $0xa0] sm:$0xff]  ;;  %v1308_v12 = vld [vmem:[#allocation5 + $0x98] sm:$0xff]  ;;  %s4259_s4 = sld [smem:[#allocation47_spill]]  ;;  %s3471_s5 = smov 120   ;;  %vm1549_vm5 = vcmask 56320  }
 0x17e   : > { %s2479_s13 = smul.u32 24, %s1216_s6  ;;  %1263 = vmatpush.msra.mxu0 %v1238_v4  ;;  %v1236_v10 = vld [vmem:[#allocation5 + $0x60] sm:$0xff]  ;;  %v1235_v13 = vld [vmem:[#allocation5 + $0x58] sm:$0xff]  ;;  %v1307_v17 = vld [vmem:[#allocation5 + $0x90] sm:$0xff]  ;;  %s4260_s25 = sld [smem:[#allocation49_spill]]  ;;  %vm1607_vm6 = vcmask 916480  }
 0x17f   : > { %1290 = vmatpush.msra.mxu1 %v1229_v6  ;;  %1333 = vmatpush.msra.mxu2 %v1310_v5  ;;  %v1227_v11 = vld [vmem:[#allocation5 + $0x20] sm:$0xff]  ;;  %v1226_v15 = vld [vmem:[#allocation5 + $0x18] sm:$0xff]  ;;  %v1234_v18 = vld [vmem:[#allocation5 + $0x50] sm:$0xff]  ;;  %s3472_s9 = smov 112   ;;  %s3473_s27 = smov 96   ;;  %vm1804_vm7 = vcmask 130048  }
 0x180   : > { %s4014_s16 = scalar_lea.vmem %s4258_s12, %s2479_s13  ;;  %1264 = vmatpush.msra.mxu0 %v1237_v7  ;;  %v1225_v19 = vld [vmem:[#allocation5 + $0x10] sm:$0xff]  ;;  %v1306_v22 = vld [vmem:[#allocation5 + $0x88] sm:$0xff]  ;;  %v1305_v27 = vld [vmem:[#allocation5 + $0x80] sm:$0xff]  ;;  %vm1711_vm8 = vcmask 1042432   ;;  %vm1707_vm9 = vcmask 23552   ;;  %vm1747_vm10 = vcmask 785408  }
 0x181   : > { %1291 = vmatpush.msra.mxu1 %v1228_v8  ;;  %v1220_v14 = vld [vmem:[%s4014_s16] sm:$0xff]  ;;  %1334 = vmatpush.msra.mxu2 %v1309_v9  ;;  %v1221_v16 = vld [vmem:[%s4014_s16 + $0x8] sm:$0xff]  ;;  %v1222_v32 = vld [vmem:[%s4014_s16 + $0x10] sm:$0x3]  ;;  %vm1776_vm11 = vcmask 261120   ;;  %s4262_s6 = sld [smem:[#allocation54_spill]] }
 0x182   : > { %1265 = vmatpush.msra.mxu0 %v1236_v10  ;;  %v1314_v20 = vrot.slane %v1220_v14, 2  ;;  %v1315_v21 = vrot.slane %v1221_v16, 2  ;;  %v1233_v23 = vld [vmem:[#allocation5 + $0x48] sm:$0xff]  ;;  %v1244_v24 = vrot.slane %v1220_v14, 1  ;;  %v1245_v25 = vrot.slane %v1221_v16, 1  ;;  %v1232_v28 = vld [vmem:[#allocation5 + $0x40] sm:$0xff] }
 0x183   : > { %1292 = vmatpush.msra.mxu1 %v1227_v11  ;;  %1335 = vmatpush.msra.mxu2 %v1308_v12  ;;  %v1224_v26 = vld [vmem:[#allocation5 + $0x8] sm:$0xff]  ;;  %v1223_v30 = vld [vmem:[#allocation5] sm:$0xff]  ;;  %v1317_v33 = vrot.slane %v1222_v32, 2  ;;  %v1247_v34 = vrot.slane %v1222_v32, 1  ;;  %v2429_v61 = vld [vmem:[%s4259_s4 + $0x158] sm:$0xff]  ;;  %s4263_s12 = sld [smem:[#allocation56_spill]] }
 0x184   : > { %1266 = vmatpush.msra.mxu0 %v1235_v13  ;;  %v1316_v29 = vsel %vm1313_vm0, %v1314_v20, %v1315_v21  ;;  %v1246_v31 = vsel %vm1243_vm1, %v1244_v24, %v1245_v25  ;;  %v2741_v45 = vld [vmem:[#allocation7] ss:$0 sm:$0xff]  ;;  %v1424_v57 = vld [vmem:[%s4259_s4 + $0x70] sm:$0xff]  ;;  %v1423_v58 = vld [vmem:[%s4259_s4 + $0x68] sm:$0xff]  ;;  %s4264_s13 = sld [smem:[#allocation58_spill]]  ;;  %vm2036_vm12 = vcmask 73728  }
 0x185   : > { %1293 = vmatpush.msra.mxu1 %v1226_v15  ;;  %1336 = vmatpush.msra.mxu2 %v1307_v17  ;;  %v1318_v35 = vsel %vm1313_vm0, %v1315_v21, %v1317_v33  ;;  %v1248_v36 = vsel %vm1243_vm1, %v1245_v25, %v1247_v34  ;;  %v1422_v59 = vld [vmem:[%s4259_s4 + $0x60] sm:$0xff]  ;;  %v1421_v62 = vld [vmem:[%s4259_s4 + $0x58] sm:$0xff]  ;;  %v2428_v63 = vld [vmem:[%s4259_s4 + $0x150] sm:$0xff]  ;;  %s4265_s16 = sld [smem:[#allocation61_spill]] }
 0x186   : > { %1267 = vmatpush.msra.mxu0 %v1234_v18  ;;  %v2430_v60 = vld [vmem:[%s4259_s4 + $0x160] sm:$0xff]  ;;  %v1420_v0 = vld [vmem:[%s4259_s4 + $0x50] sm:$0xff]  ;;  %v2427_v1 = vld [vmem:[%s4259_s4 + $0x148] sm:$0xff] }
 0x187   : > { %1294 = vmatpush.msra.mxu1 %v1225_v19  ;;  %1337 = vmatpush.msra.mxu2 %v1306_v22  ;;  %v1419_v2 = vld [vmem:[%s4259_s4 + $0x48] sm:$0xff]  ;;  %v2426_v3 = vld [vmem:[%s4259_s4 + $0x140] sm:$0xff]  ;;  %v2425_v5 = vld [vmem:[%s4259_s4 + $0x138] sm:$0xff] }
 0x188   : > { %1268 = vmatpush.msra.mxu0 %v1233_v23  ;;  %v1418_v4 = vld [vmem:[%s4259_s4 + $0x40] sm:$0xff]  ;;  %v1417_v7 = vld [vmem:[%s4259_s4 + $0x38] sm:$0xff]  ;;  %v2424_v9 = vld [vmem:[%s4259_s4 + $0x130] sm:$0xff] }
 0x189   : > { %1295 = vmatpush.msra.mxu1 %v1224_v26  ;;  %1338 = vmatpush.msra.mxu2 %v1305_v27  ;;  %v1416_v10 = vld [vmem:[%s4259_s4 + $0x30] sm:$0xff]  ;;  %v2423_v11 = vld [vmem:[%s4259_s4 + $0x128] sm:$0xff]  ;;  %v2422_v13 = vld [vmem:[%s4259_s4 + $0x120] sm:$0xff] }
 0x18a   : > { %1269 = vmatpush.msra.mxu0 %v1232_v28  ;;  %2394 = vmatmul.msk.f32.vlgmr.msra.gmra.mxu2 %vm1249_vm2, %v1316_v29  ;;  %v1415_v12 = vld [vmem:[%s4259_s4 + $0x28] sm:$0xff]  ;;  %v1412_v20 = vld [vmem:[%s4259_s4 + $0x10] sm:$0xff]  ;;  %v2412_v21 = vld [vmem:[%s4259_s4 + $0xe0] sm:$0xff] }
 0x18b   : > { %1296 = vmatpush.msra.mxu1 %v1223_v30  ;;  %2390 = vmatmul.msk.f32.vlgmr.msra.gmra.mxu0 %vm1249_vm2, %v1246_v31  ;;  %v1375_v18 = vld [vmem:[#allocation8] sm:$0xff]  ;;  %v2411_v23 = vld [vmem:[%s4259_s4 + $0xd8] sm:$0xff]  ;;  %v2410_v24 = vld [vmem:[%s4259_s4 + $0xd0] sm:$0xff] }
 0x18c   : > { %2392 = vmatmul.msk.f32.vlgmr.msra.gmra.mxu1 %vm1249_vm2, %v1220_v14  ;;  %1472 = vmatpush.msrb.mxu0 %v1424_v57  ;;  %v1414_v14 = vld [vmem:[%s4259_s4 + $0x20] sm:$0xff]  ;;  %v2413_v19 = vld [vmem:[%s4259_s4 + $0xe8] sm:$0xff]  ;;  %v2407_v28 = vld [vmem:[%s4259_s4 + $0xb8] sm:$0xff] }
 0x18d   : > { %1513 = vmatpush.msrb.mxu1 %v2430_v60  ;;  %v1411_v22 = vld [vmem:[%s4259_s4 + $0x8] sm:$0xff]  ;;  %v2408_v27 = vld [vmem:[%s4259_s4 + $0xc0] sm:$0xff]  ;;  %v2406_v29 = vld [vmem:[%s4259_s4 + $0xb0] sm:$0xff] }
 0x18e   : > { %1473 = vmatpush.msrb.mxu0 %v1423_v58  ;;  %v1376_v25 = vld [vmem:[#allocation8 + $0x8] sm:$0x3]  ;;  %v1410_v31 = vld [vmem:[%s4259_s4] sm:$0xff]  ;;  %v2421_v33 = vld [vmem:[%s4259_s4 + $0x118] sm:$0xff] }
 0x18f   : > { %1514 = vmatpush.msrb.mxu1 %v2429_v61  ;;  %v2409_v26 = vld [vmem:[%s4259_s4 + $0xc8] sm:$0xff]  ;;  %v2404_v32 = vld [vmem:[%s4259_s4 + $0xa0] sm:$0xff]  ;;  %v2403_v34 = vld [vmem:[%s4259_s4 + $0x98] sm:$0xff] }
 0x190   : > { %1474 = vmatpush.msrb.mxu0 %v1422_v59  ;;  %v2405_v30 = vld [vmem:[%s4259_s4 + $0xa8] sm:$0xff] }
 0x191   : > { %1515 = vmatpush.msrb.mxu1 %v2428_v63  ;;  %v1588_v63 = vld [vmem:[%s4260_s25 + $0x60] sm:$0xff] }
 0x192   : > { %2395 = vmatmul.msk.f32.gmra.mxu2 %vm1249_vm2, %v1318_v35  ;;  %1475 = vmatpush.msrb.mxu0 %v1421_v62  ;;  %v2420_v35 = vld [vmem:[%s4259_s4 + $0x110] sm:$0xff]  ;;  %v1589_v62 = vld [vmem:[%s4260_s25 + $0x68] sm:$0xff] }
 0x193   : > { %2391 = vmatmul.msk.f32.gmra.mxu0 %vm1249_vm2, %v1248_v36  ;;  %1516 = vmatpush.msrb.mxu1 %v2427_v1  ;;  %v2402_v36 = vld [vmem:[%s4259_s4 + $0x90] sm:$0xff] }
 0x194   : > { %2393 = vmatmul.msk.f32.gmra.mxu1 %vm1249_vm2, %v1221_v16  ;;  %1476 = vmatpush.msrb.mxu0 %v1420_v0  ;;  %v1413_v16 = vld [vmem:[%s4259_s4 + $0x18] sm:$0xff]  ;;  %v1586_v1 = vld [vmem:[%s4260_s25 + $0x50] sm:$0xff] }
 0x195   : > { %1517 = vmatpush.msrb.mxu1 %v2426_v3  ;;  %v1587_v0 = vld [vmem:[%s4260_s25 + $0x58] sm:$0xff]  ;;  %v2463_v3 = vld [vmem:[%s4260_s25 + $0x148] sm:$0xff] }
 0x196   : > { %1477 = vmatpush.msrb.mxu0 %v1419_v2  ;;  %v1585_v2 = vld [vmem:[%s4260_s25 + $0x48] sm:$0xff] }
 0x197   : > { %1518 = vmatpush.msrb.mxu1 %v2425_v5  ;;  %v2462_v5 = vld [vmem:[%s4260_s25 + $0x140] sm:$0xff] }
 0x198   : > { %1478 = vmatpush.msrb.mxu0 %v1418_v4  ;;  %v1584_v4 = vld [vmem:[%s4260_s25 + $0x40] sm:$0xff] }
 0x199   : > { %1519 = vmatpush.msrb.mxu1 %v2424_v9  ;;  %v2460_v9 = vld [vmem:[%s4260_s25 + $0x130] sm:$0xff] }
 0x19a   : > { %1479 = vmatpush.msrb.mxu0 %v1417_v7  ;;  %v2461_v7 = vld [vmem:[%s4260_s25 + $0x138] sm:$0xff] }
 0x19b   : > { %1520 = vmatpush.msrb.mxu1 %v2423_v11  ;;  %v2459_v11 = vld [vmem:[%s4260_s25 + $0x128] sm:$0xff] }
 0x19c   : > { %1480 = vmatpush.msrb.mxu0 %v1416_v10  ;;  %v1581_v10 = vld [vmem:[%s4260_s25 + $0x28] sm:$0xff] }
 0x19d   : > { %1521 = vmatpush.msrb.mxu1 %v2422_v13  ;;  %v2458_v13 = vld [vmem:[%s4260_s25 + $0x120] sm:$0xff] }
 0x19e   : > { %1481 = vmatpush.msrb.mxu0 %v1415_v12  ;;  %v1580_v12 = vld [vmem:[%s4260_s25 + $0x20] sm:$0xff] }
 0x19f   : > { %1522 = vmatpush.msrb.mxu1 %v2421_v33  ;;  %v2455_v33 = vld [vmem:[%s4260_s25 + $0x108] sm:$0xff] }
 0x1a0   : > { %1482 = vmatpush.msrb.mxu0 %v1414_v14  ;;  %v1579_v14 = vld [vmem:[%s4260_s25 + $0x18] sm:$0xff] }
 0x1a1   : > { %1523 = vmatpush.msrb.mxu1 %v2420_v35  ;;  %v2453_v35 = vld [vmem:[%s4260_s25 + $0xf8] sm:$0xff] }
 0x1a2   : > { %1483 = vmatpush.msrb.mxu0 %v1413_v16  ;;  %v1578_v16 = vld [vmem:[%s4260_s25 + $0x10] sm:$0xff] }
 0x1a4   : > { %1484 = vmatpush.msrb.mxu0 %v1412_v20  ;;  %v1548_v20 = vld [vmem:[#allocation11] sm:$0x3f] }
 0x1a6   : > { %1485 = vmatpush.msrb.mxu0 %v1411_v22  ;;  %v2446_v22 = vld [vmem:[%s4260_s25 + $0xd0] sm:$0xff] }
 0x1a8   : > { %1486 = vmatpush.msrb.mxu0 %v1410_v31  ;;  %v2437_v31 = vld [vmem:[%s4260_s25 + $0x88] sm:$0xff] }
 0x1aa   : > { %1672 = vmatpush.msra.mxu0 %v2463_v3  ;;  %v1741_v3 = vld [vmem:[#allocation16 + $0x30] sm:$0xff] }
 0x1ac   : > { %1673 = vmatpush.msra.mxu0 %v2462_v5  ;;  %v1739_v5 = vld [vmem:[#allocation16 + $0x20] sm:$0xff] }
 0x1ae   : > { %1674 = vmatpush.msra.mxu0 %v2461_v7  ;;  %v1737_v7 = vld [vmem:[#allocation16 + $0x10] sm:$0xff] }
 0x1b0   : > { %1675 = vmatpush.msra.mxu0 %v2460_v9  ;;  %v1735_v9 = vld [vmem:[#allocation16] sm:$0xff] }
 0x1b2   : > { %1676 = vmatpush.msra.mxu0 %v2459_v11  ;;  %v1773_v11 = vld [vmem:[#allocation17 + $0x10] sm:$0xff] }
 0x1b4   : > { %1677 = vmatpush.msra.mxu0 %v2458_v13 }
 0x208   : > { %v1271_v37 = vpop.f32.mrf.mxu0 }
 0x209   : > { %v1298_v38 = vpop.f32.mrf.mxu1 }
 0x20a   : > { %v1299_v42 = vadd.f32 %v1298_v38, %v1271_v37  ;;  %v2419_v37 = vld [vmem:[%s4259_s4 + $0x108] sm:$0xff] }
 0x20b   : > { %v2401_v38 = vld [vmem:[%s4259_s4 + $0x88] sm:$0xff]  ;;  %1524 = vmatpush.msrb.mxu1 %v2419_v37  ;;  %v2452_v37 = vld [vmem:[%s4260_s25 + $0xf0] sm:$0xff] }
 0x20d   : > { %v1340_v39 = vpop.f32.mrf.mxu2 }
 0x20e   : > { %v1346_v44 = vadd.f32 %v1340_v39, %v1299_v42  ;;  %v2418_v39 = vld [vmem:[%s4259_s4 + $0x100] sm:$0xff]  ;;  %v2399_v42 = vld [vmem:[%s4259_s4 + $0x78] sm:$0xff] }
 0x20f   : > { %1525 = vmatpush.msrb.mxu1 %v2418_v39  ;;  %v1576_v39 = vld [vmem:[%s4260_s25] sm:$0xff] }
 0x210   : > { %v1274_v40 = vpop.f32.mrf.mxu0  ;;  %v1352_v49 = vadd.f32 %v2741_v45, %v1346_v44 }
 0x211   : > { %v1301_v41 = vpop.f32.mrf.mxu1 }
 0x212   : > { %v1302_v43 = vadd.f32 %v1301_v41, %v1274_v40  ;;  %v1354_v52 = vmax.f32 %v1352_v49, 0.0  ;;  %v2400_v40 = vld [vmem:[%s4259_s4 + $0x80] sm:$0xff]  ;;  %v2417_v41 = vld [vmem:[%s4259_s4 + $0xf8] sm:$0xff] }
 0x213   : > { %1526 = vmatpush.msrb.mxu1 %v2417_v41  ;;  %v2434_v41 = vld [vmem:[%s4260_s25 + $0x70] sm:$0xff] }
 0x214   : > { %v1358_v54 = vrot.slane %v1354_v52, 1 }
 0x215   : > { %v1343_v46 = vpop.f32.mrf.mxu2 }
 0x216   : > { %v1347_v47 = vadd.f32 %v1343_v46, %v1302_v43  ;;  %v2416_v43 = vld [vmem:[%s4259_s4 + $0xf0] sm:$0xff] }
 0x217   : > { %1527 = vmatpush.msrb.mxu1 %v2416_v43 }
 0x218   : > { %v1353_v48 = vadd.f32 %v2741_v45, %v1347_v47 }
 0x21a   : > { %v1355_v50 = vmax.f32 %v1353_v48, 0.0 }
 0x21c   : > { %v1359_v51 = vrot.slane %v1355_v50, 1 }
 0x21e   : > { %v1364_v53 = vmax.f32 %v1355_v50, %v1359_v51  ;;  %v1360_v55 = vsel %vm1243_vm1, %v1358_v54, %v1359_v51 }
 0x21f   : > { %v1363_v56 = vmax.f32 %v1354_v52, %v1360_v55  ;;  %v2742_v55 = vld [vmem:[#allocation10] ss:$0 sm:$0xff] }
 0x220   : > { %1369 = vrot.lane.b32.xlu0 %v1364_v53, %s3471_s5 }
 0x228   : > { %1367 = vrot.lane.b32.xlu0 %v1363_v56, %s3471_s5  ;;  %s4266_s5 = sld [smem:[#allocation63_spill]] }
 0x292   : > { %v1370_v6 = vpop.permute.xlu0 %1369 }
 0x293   : > { %v1374_v8 = vmax.f32 %v1364_v53, %v1370_v6  ;;  %v1583_v6 = vld [vmem:[%s4260_s25 + $0x38] sm:$0xff] }
 0x295   : > { %2396 = vmatpush.msk.msra.mxu3 %vm1243_vm1, %v1374_v8  ;;  %v1582_v8 = vld [vmem:[%s4260_s25 + $0x30] sm:$0xff] }
 0x29a   : > { %v1368_v15 = vpop.permute.xlu0 %1367 }
 0x29b   : > { %v1373_v17 = vmax.f32 %v1363_v56, %v1368_v15  ;;  %v2457_v15 = vld [vmem:[%s4260_s25 + $0x118] sm:$0xff] }
 0x29c   : > { %1678 = vmatpush.msra.mxu0 %v2457_v15  ;;  %v1832_v15 = vld [vmem:[#allocation22 + $0x18] sm:$0xff] }
 0x29d   : > { %1402 = vmatpush.msra.mxu3 %v1373_v17  ;;  %v2456_v17 = vld [vmem:[%s4260_s25 + $0x110] sm:$0xff] }
 0x29e   : > { %2397 = vmatmul.msk.f32.vlgmr.msra.gmra.mxu3 %vm1377_vm3, %v1375_v18  ;;  %1679 = vmatpush.msra.mxu0 %v2456_v17  ;;  %v1830_v17 = vld [vmem:[#allocation22 + $0x8] sm:$0xff] }
 0x29f   : > { %1450 = vmatpush.msrb.mxu3 %v2413_v19 }
 0x2a0   : > { %1680 = vmatpush.msra.mxu0 %v2455_v33  ;;  %v1888_v33 = vld [vmem:[#allocation25 + $0x10] sm:$0xff] }
 0x2a1   : > { %1451 = vmatpush.msrb.mxu3 %v2412_v21  ;;  %v2447_v21 = vld [vmem:[%s4260_s25 + $0xd8] sm:$0xff] }
 0x2a3   : > { %1452 = vmatpush.msrb.mxu3 %v2411_v23  ;;  %v2445_v23 = vld [vmem:[%s4260_s25 + $0xc8] sm:$0xff] }
 0x2a5   : > { %1453 = vmatpush.msrb.mxu3 %v2410_v24  ;;  %v2444_v24 = vld [vmem:[%s4260_s25 + $0xc0] sm:$0xff] }
 0x2a6   : > { %2398 = vmatmul.msk.f32.gmra.mxu3 %vm1377_vm3, %v1376_v25  ;;  %v2443_v25 = vld [vmem:[%s4260_s25 + $0xb8] sm:$0xff] }
 0x2a7   : > { %1454 = vmatpush.msrb.mxu3 %v2409_v26  ;;  %v2442_v26 = vld [vmem:[%s4260_s25 + $0xb0] sm:$0xff] }
 0x2a9   : > { %1455 = vmatpush.msrb.mxu3 %v2408_v27  ;;  %v2441_v27 = vld [vmem:[%s4260_s25 + $0xa8] sm:$0xff] }
 0x2ab   : > { %1456 = vmatpush.msrb.mxu3 %v2407_v28  ;;  %v2440_v28 = vld [vmem:[%s4260_s25 + $0xa0] sm:$0xff] }
 0x2ad   : > { %1457 = vmatpush.msrb.mxu3 %v2406_v29  ;;  %v2439_v29 = vld [vmem:[%s4260_s25 + $0x98] sm:$0xff] }
 0x2af   : > { %1458 = vmatpush.msrb.mxu3 %v2405_v30  ;;  %v2438_v30 = vld [vmem:[%s4260_s25 + $0x90] sm:$0xff] }
 0x2b1   : > { %1459 = vmatpush.msrb.mxu3 %v2404_v32  ;;  %v2436_v32 = vld [vmem:[%s4260_s25 + $0x80] sm:$0xff] }
 0x2b3   : > { %1460 = vmatpush.msrb.mxu3 %v2403_v34  ;;  %v2454_v34 = vld [vmem:[%s4260_s25 + $0x100] sm:$0xff] }
 0x2b4   : > { %1681 = vmatpush.msra.mxu0 %v2454_v34  ;;  %v1775_v34 = vld [vmem:[#allocation19] sm:$0x1] }
 0x2b5   : > { %1461 = vmatpush.msrb.mxu3 %v2402_v36  ;;  %v1577_v36 = vld [vmem:[%s4260_s25 + $0x8] sm:$0xff] }
 0x2b6   : > { %1682 = vmatpush.msra.mxu0 %v2453_v35 }
 0x2b7   : > { %1462 = vmatpush.msrb.mxu3 %v2401_v38  ;;  %v2435_v38 = vld [vmem:[%s4260_s25 + $0x78] sm:$0xff] }
 0x2b8   : > { %1683 = vmatpush.msra.mxu0 %v2452_v37  ;;  %v1833_v37 = vld [vmem:[%s4262_s6] sm:$0x1]  ;;  %s1214_s6 = scalar_lea.vmem [#allocation32], %s3967_s15 }
 0x2b9   : > { %1463 = vmatpush.msrb.mxu3 %v2400_v40  ;;  %v2451_v40 = vld [vmem:[%s4260_s25 + $0xe8] sm:$0xff] }
 0x2ba   : > { %1684 = vmatpush.msra.mxu0 %v2451_v40 }
 0x2bb   : > { %1464 = vmatpush.msrb.mxu3 %v2399_v42  ;;  %v2450_v42 = vld [vmem:[%s4260_s25 + $0xe0] sm:$0xff] }
 0x2bc   : > { %1685 = vmatpush.msra.mxu0 %v2450_v42  ;;  %v1886_v42 = vld [vmem:[#allocation25] sm:$0xff] }
 0x2bd   : > { %1634 = vmatpush.msra.mxu3 %v1589_v62  ;;  %v1746_v62 = vld [vmem:[#allocation16 + $0x58] sm:$0xff] }
 0x2bf   : > { %1635 = vmatpush.msra.mxu3 %v1588_v63  ;;  %v1745_v63 = vld [vmem:[#allocation16 + $0x50] sm:$0xff] }
 0x2c1   : > { %1636 = vmatpush.msra.mxu3 %v1587_v0  ;;  %v1744_v0 = vld [vmem:[#allocation16 + $0x48] sm:$0xff] }
 0x2c3   : > { %1637 = vmatpush.msra.mxu3 %v1586_v1  ;;  %v1743_v1 = vld [vmem:[#allocation16 + $0x40] sm:$0xff] }
 0x2c5   : > { %1638 = vmatpush.msra.mxu3 %v1585_v2  ;;  %v1742_v2 = vld [vmem:[#allocation16 + $0x38] sm:$0xff] }
 0x2c7   : > { %1639 = vmatpush.msra.mxu3 %v1584_v4  ;;  %v1740_v4 = vld [vmem:[#allocation16 + $0x28] sm:$0xff] }
 0x2c9   : > { %1640 = vmatpush.msra.mxu3 %v1583_v6  ;;  %v1738_v6 = vld [vmem:[#allocation16 + $0x18] sm:$0xff] }
 0x2cb   : > { %1641 = vmatpush.msra.mxu3 %v1582_v8  ;;  %v1736_v8 = vld [vmem:[#allocation16 + $0x8] sm:$0xff] }
 0x2cd   : > { %1642 = vmatpush.msra.mxu3 %v1581_v10  ;;  %v1774_v10 = vld [vmem:[#allocation17 + $0x18] sm:$0xff] }
 0x2cf   : > { %1643 = vmatpush.msra.mxu3 %v1580_v12  ;;  %v1772_v12 = vld [vmem:[#allocation17 + $0x8] sm:$0xff] }
 0x2d1   : > { %1644 = vmatpush.msra.mxu3 %v1579_v14  ;;  %v1771_v14 = vld [vmem:[#allocation17] sm:$0xff] }
 0x2d3   : > { %1645 = vmatpush.msra.mxu3 %v1578_v16  ;;  %v1831_v16 = vld [vmem:[#allocation22 + $0x10] sm:$0xff] }
 0x2d5   : > { %1646 = vmatpush.msra.mxu3 %v1577_v36 }
 0x2d7   : > { %1647 = vmatpush.msra.mxu3 %v1576_v39 }
 0x321   : > { %v1404_v44 = vpop.f32.mrf.mxu3 }
 0x322   : > { %2415 = vmatmul.msk.f32.vlgmr.msrb.gmra.mxu0 %vm1446_vm4, %v1404_v44  ;;  %v1443_v46 = vrot.slane %v1404_v44, 1  ;;  %v1507_v47 = vrot.slane %v1404_v44, 2 }
 0x329   : > { %v1407_v45 = vpop.f32.mrf.mxu3 }
 0x32a   : > { %v1444_v48 = vrot.slane %v1407_v45, 1  ;;  %v1508_v49 = vrot.slane %v1407_v45, 2 }
 0x32c   : > { %v1445_v50 = vsel %vm1243_vm1, %v1443_v46, %v1444_v48  ;;  %v1509_v51 = vsel %vm1313_vm0, %v1507_v47, %v1508_v49  ;;  %v2743_v49 = vld [vmem:[#allocation13] ss:$0 sm:$0xff] }
 0x32d   : > { %2414 = vmatmul.msk.f32.vlgmr.msrb.gmra.mxu3 %vm1446_vm4, %v1445_v50  ;;  %2431 = vmatmul.msk.f32.vlgmr.msrb.gmra.mxu1 %vm1446_vm4, %v1509_v51 }
 0x39f   : > { %v1488_v52 = vpop.f32.mrf.mxu0 }
 0x3aa   : > { %v1529_v56 = vpop.f32.mrf.mxu1 }
 0x3b0   : > { %v1466_v53 = vpop.f32.mrf.mxu3 }
 0x3b1   : > { %v1489_v54 = vadd.f32 %v1488_v52, %v1466_v53 }
 0x3b3   : > { %v1532_v57 = vadd.f32 %v1529_v56, %v1489_v54  ;;  %v1802_v56 = vld [vmem:[#allocation20 + $0x8] sm:$0xff] }
 0x3b4   : > { %1822 = vmatpush.msrb.mxu3 %v1802_v56 }
 0x3b5   : > { %v1537_v58 = vadd.f32 %v2742_v55, %v1532_v57  ;;  %v1801_v57 = vld [vmem:[#allocation20] sm:$0xff] }
 0x3b6   : > { %1823 = vmatpush.msrb.mxu3 %v1801_v57  ;;  %v1974_v57 = vld [vmem:[#allocation29 + $0x18] sm:$0xff] }
 0x3b7   : > { %v1538_v59 = vmax.f32 %v1537_v58, 0.0  ;;  %v1800_v58 = vld [vmem:[%s1046_s18] sm:$0x1]  ;;  %s4261_s18 = sld [smem:[#allocation52_spill]] }
 0x3b9   : > { %v1540_v60 = vrot.slane %v1538_v59, 1 }
 0x3bb   : > { %v1542_v61 = vmax.f32 %v1538_v59, %v1540_v60 }
 0x3bd   : > { %1544 = vrot.lane.b32.xlu1 %v1542_v61, %s3472_s9  ;;  %s4267_s9 = sld [smem:[#allocation64_spill]] }
 0x42f   : > { %v1545_v18 = vpop.permute.xlu1 %1544 }
 0x430   : > { %v1547_v19 = vmax.f32 %v1542_v61, %v1545_v18  ;;  %v1706_v61 = vld [vmem:[#allocation14] sm:$0x1]  ;;  %v1829_v18 = vld [vmem:[#allocation22] sm:$0xff] }
 0x432   : > { %2432 = vmatpush.msk.msrb.mxu2 %vm1243_vm1, %v1547_v19  ;;  %v1803_v19 = vld [vmem:[%s4261_s18] sm:$0x1] }
 0x433   : > { %2433 = vmatmul.msk.f32.vlgmr.msrb.gmra.mxu2 %vm1549_vm5, %v1548_v20 }
 0x434   : > { %1612 = vmatpush.msra.mxu2 %v2447_v21 }
 0x436   : > { %1613 = vmatpush.msra.mxu2 %v2446_v22 }
 0x438   : > { %1614 = vmatpush.msra.mxu2 %v2445_v23 }
 0x43a   : > { %1615 = vmatpush.msra.mxu2 %v2444_v24  ;;  %v1917_v24 = vld [vmem:[#allocation26 + $0x18] sm:$0xff] }
 0x43c   : > { %1616 = vmatpush.msra.mxu2 %v2443_v25  ;;  %v1916_v25 = vld [vmem:[#allocation26 + $0x10] sm:$0xff] }
 0x43e   : > { %1617 = vmatpush.msra.mxu2 %v2442_v26  ;;  %v1915_v26 = vld [vmem:[#allocation26 + $0x8] sm:$0xff] }
 0x440   : > { %1618 = vmatpush.msra.mxu2 %v2441_v27  ;;  %v1861_v27 = vld [vmem:[#allocation23 + $0x18] sm:$0xff] }
 0x442   : > { %1619 = vmatpush.msra.mxu2 %v2440_v28  ;;  %v1914_v28 = vld [vmem:[#allocation26] sm:$0xff] }
 0x444   : > { %1620 = vmatpush.msra.mxu2 %v2439_v29  ;;  %v1860_v29 = vld [vmem:[#allocation23 + $0x10] sm:$0xff] }
 0x446   : > { %1621 = vmatpush.msra.mxu2 %v2438_v30  ;;  %v1859_v30 = vld [vmem:[#allocation23 + $0x8] sm:$0xff] }
 0x448   : > { %1622 = vmatpush.msra.mxu2 %v2437_v31  ;;  %v1858_v31 = vld [vmem:[#allocation23] sm:$0xff] }
 0x44a   : > { %1623 = vmatpush.msra.mxu2 %v2436_v32  ;;  %v1889_v32 = vld [vmem:[#allocation25 + $0x18] sm:$0xff] }
 0x44c   : > { %1624 = vmatpush.msra.mxu2 %v2435_v38 }
 0x44e   : > { %1625 = vmatpush.msra.mxu2 %v2434_v41  ;;  %v1887_v41 = vld [vmem:[#allocation25 + $0x8] sm:$0xff] }
 0x450   : > { %1792 = vmatpush.msrb.mxu2 %v1774_v10  ;;  %v2004_v10 = vld [vmem:[#allocation31] sm:$0xff] }
 0x452   : > { %1793 = vmatpush.msrb.mxu2 %v1773_v11  ;;  %v1979_v11 = vld [vmem:[%s4266_s5] sm:$0x1] }
 0x454   : > { %1794 = vmatpush.msrb.mxu2 %v1772_v12 }
 0x456   : > { %1795 = vmatpush.msrb.mxu2 %v1771_v14 }
 0x4b6   : > { %v1573_v43 = vpop.f32.mrf.mxu2 }
 0x4b7   : > { %v1606_v44 = vrot.slane %v1573_v43, 1  ;;  %v1667_v45 = vrot.slane %v1573_v43, 2  ;;  %2449 = vmatmul.msk.f32.vlgmr.msra.gmra.mxu3 %vm1607_vm6, %v1573_v43  ;;  %v1921_v43 = vld [vmem:[#allocation28 + $0x18] sm:$0xff] }
 0x4b8   : > { %1878 = vmatpush.msra.mxu3 %v1861_v27 }
 0x4b9   : > { %2448 = vmatmul.msk.f32.vlgmr.msra.gmra.mxu2 %vm1607_vm6, %v1606_v44  ;;  %2464 = vmatmul.msk.f32.vlgmr.msra.gmra.mxu0 %vm1607_vm6, %v1667_v45  ;;  %v1920_v44 = vld [vmem:[#allocation28 + $0x10] sm:$0xff]  ;;  %v1862_v45 = vld [vmem:[%s4263_s12] sm:$0x1]  ;;  %s2073_s12 = sshll.u32 %s1214_s6, 4  ;;  %s2074_s12 = int_to_ptr.vmem [resolvable:$true] %s2073_s12 }
 0x4ba   : > { %1849 = vmatpush.msra.mxu2 %v1832_v15  ;;  %1879 = vmatpush.msra.mxu3 %v1860_v29  ;;  %v2012_v15 = vld [vmem:[%s4267_s9] sm:$0x1] }
 0x4bc   : > { %1850 = vmatpush.msra.mxu2 %v1831_v16  ;;  %1880 = vmatpush.msra.mxu3 %v1859_v30 }
 0x4be   : > { %1851 = vmatpush.msra.mxu2 %v1830_v17  ;;  %1881 = vmatpush.msra.mxu3 %v1858_v31 }
 0x4bf   : > { %2469 = vmatmul.msk.f32.vlgmr.msrb.gmra.mxu3 %vm1804_vm7, %v1800_v58  ;;  %v1973_v58 = vld [vmem:[#allocation29 + $0x10] sm:$0xff] }
 0x4c0   : > { %1852 = vmatpush.msra.mxu2 %v1829_v18 }
 0x536   : > { %v1687_v50 = vpop.f32.mrf.mxu0 }
 0x53a   : > { %v1649_v47 = vpop.f32.mrf.mxu3 }
 0x53c   : > { %v1627_v46 = vpop.f32.mrf.mxu2 }
 0x53d   : > { %v1650_v48 = vadd.f32 %v1649_v47, %v1627_v46 }
 0x53f   : > { %v1690_v51 = vadd.f32 %v1687_v50, %v1650_v48  ;;  %v1919_v48 = vld [vmem:[#allocation28 + $0x8] sm:$0xff]  ;;  %v1978_v50 = vld [vmem:[#allocation29 + $0x38] sm:$0xff] }
 0x540   : > { %1991 = vmatpush.msrb.mxu3 %v1978_v50 }
 0x541   : > { %v1695_v52 = vadd.f32 %v2743_v49, %v1690_v51  ;;  %v1918_v49 = vld [vmem:[#allocation28] sm:$0xff]  ;;  %v1977_v51 = vld [vmem:[#allocation29 + $0x30] sm:$0xff] }
 0x542   : > { %v1825_v20 = vpop.f32.mrf.mxu3  ;;  %1992 = vmatpush.msrb.mxu3 %v1977_v51 }
 0x543   : > { %v1696_v53 = vmax.f32 %v1695_v52, 0.0  ;;  %v1826_v22 = vadd.f32 %v1825_v20, %v1803_v19  ;;  %v1976_v52 = vld [vmem:[#allocation29 + $0x28] sm:$0xff] }
 0x544   : > { %1993 = vmatpush.msrb.mxu3 %v1976_v52 }
 0x545   : > { %v1698_v54 = vrot.slane %v1696_v53, 1  ;;  %v1828_v23 = vmax.f32 %v1826_v22, 0.0 }
 0x547   : > { %v1700_v55 = vmax.f32 %v1696_v53, %v1698_v54  ;;  %v1975_v53 = vld [vmem:[#allocation29 + $0x20] sm:$0xff]  ;;  %v1890_v54 = vld [vmem:[%s4264_s13] sm:$0x1] }
 0x548   : > { %1994 = vmatpush.msrb.mxu3 %v1975_v53 }
 0x549   : > { %1702 = vrot.lane.b32.xlu1 %v1700_v55, %s3473_s27  ;;  %s4268_s27 = sld [smem:[#allocation65_spill]] }
 0x54a   : > { %1995 = vmatpush.msrb.mxu3 %v1974_v57 }
 0x54c   : > { %1996 = vmatpush.msrb.mxu3 %v1973_v58 }
 0x54f   : > { %s2071_s18 = scalar_lea.hbm %s4268_s27, %s4240_s8  ;;  %s3338_s9 = scalar_lea.hbm %s4268_s27, 2 }
 0x550   : > { %s2075_s13 = sshll.u32 %s2071_s18, 4  ;;  %s2076_s13 = int_to_ptr.hbm [resolvable:$true] %s2075_s13 }
 0x551   : > { %s3332_s8 = sshra.s32 %s2076_s13, 4  ;;  %s3333_s8 = int_to_ptr.hbm [resolvable:$true] %s3332_s8 }
 0x552   : > { %s3334_s5 = scalar_lea.hbm %s3333_s8, 1  ;;  %p3339_p9 = scmp.lt.s32.totalorder %s3333_s8, %s4268_s27 }
 0x553   : > { %p3335_p6 = scmp.ne.s32.totalorder %s3333_s8, %s3334_s5  ;;  %p3340_p10 = scmp.lt.s32.totalorder %s3338_s9, %s3334_s5 }
 0x555   : > { %p3336_p8 = pnand %p3335_p6, %p3942_p2  ;;  %p3341_p12 = por %p3340_p10, %p3339_p9 }
 0x557   : > { %p3337_p7 = pneg %p3336_p8 }
 0x559   : > { %p3342_p13 = pnand %p3341_p12, %p3337_p7 }
 0x5bb   : > { %v1703_v59 = vpop.permute.xlu1 %1702 }
 0x5bc   : > { %v1705_v60 = vmax.f32 %v1700_v55, %v1703_v59  ;;  %v1972_v59 = vld [vmem:[#allocation29 + $0x8] sm:$0xff] }
 0x5bd   : > { %1997 = vmatpush.msrb.mxu3 %v1972_v59 }
 0x5be   : > { %2465 = vmatpush.msk.msra.mxu1 %vm1711_vm8, %v1705_v60  ;;  %v1971_v60 = vld [vmem:[#allocation29] sm:$0xff] }
 0x5bf   : > { %2466 = vmatmul.msk.f32.vlgmr.msra.gmra.mxu1 %vm1707_vm9, %v1706_v61  ;;  %1998 = vmatpush.msrb.mxu3 %v1971_v60  ;;  %v2011_v61 = vld [vmem:[#allocation31 + $0x38] sm:$0xff] }
 0x5c0   : > { %1755 = vmatpush.msrb.mxu1 %v1746_v62  ;;  %v2010_v62 = vld [vmem:[#allocation31 + $0x30] sm:$0xff]  ;;  %2024 = vmatpush.msrb.mxu0 %v2011_v61 }
 0x5c2   : > { %1756 = vmatpush.msrb.mxu1 %v1745_v63  ;;  %v2009_v63 = vld [vmem:[#allocation31 + $0x28] sm:$0xff]  ;;  %2025 = vmatpush.msrb.mxu0 %v2010_v62 }
 0x5c4   : > { %1757 = vmatpush.msrb.mxu1 %v1744_v0  ;;  %v2008_v0 = vld [vmem:[#allocation31 + $0x20] sm:$0xff]  ;;  %2026 = vmatpush.msrb.mxu0 %v2009_v63 }
 0x5c6   : > { %1758 = vmatpush.msrb.mxu1 %v1743_v1  ;;  %v2007_v1 = vld [vmem:[#allocation31 + $0x18] sm:$0xff]  ;;  %2027 = vmatpush.msrb.mxu0 %v2008_v0 }
 0x5c8   : > { %1759 = vmatpush.msrb.mxu1 %v1742_v2  ;;  %2028 = vmatpush.msrb.mxu0 %v2007_v1 }
 0x5ca   : > { %1760 = vmatpush.msrb.mxu1 %v1741_v3 }
 0x5cc   : > { %1761 = vmatpush.msrb.mxu1 %v1740_v4  ;;  %v1968_v4 = vld [vmem:[%s4265_s16] sm:$0x1]  ;;  %s2063_s16 = scalar_lea.sflag [#allocation4], %s3967_s15 }
 0x5ce   : > { %1762 = vmatpush.msrb.mxu1 %v1739_v5 }
 0x5d0   : > { %1763 = vmatpush.msrb.mxu1 %v1738_v6 }
 0x5d2   : > { %1764 = vmatpush.msrb.mxu1 %v1737_v7 }
 0x5d4   : > { %1765 = vmatpush.msrb.mxu1 %v1736_v8  ;;  %v2006_v8 = vld [vmem:[#allocation31 + $0x10] sm:$0xff] }
 0x5d5   : > { %2029 = vmatpush.msrb.mxu0 %v2006_v8 }
 0x5d6   : > { %1766 = vmatpush.msrb.mxu1 %v1735_v9  ;;  %v2005_v9 = vld [vmem:[#allocation31 + $0x8] sm:$0xff] }
 0x5d7   : > { %2030 = vmatpush.msrb.mxu0 %v2005_v9 }
 0x5d8   : > { %1960 = vmatpush.msra.mxu1 %v1917_v24 }
 0x5d9   : > { %2031 = vmatpush.msrb.mxu0 %v2004_v10 }
 0x5da   : > { %1961 = vmatpush.msra.mxu1 %v1916_v25 }
 0x5dc   : > { %1962 = vmatpush.msra.mxu1 %v1915_v26 }
 0x5de   : > { %1963 = vmatpush.msra.mxu1 %v1914_v28 }
 0x63c   : > { %v1732_v13 = vpop.f32.mrf.mxu1 }
 0x63d   : > { %2467 = vmatmul.msk.f32.vlgmr.msrb.gmra.mxu1 %vm1747_vm10, %v1732_v13 }
 0x6ba   : > { %v1768_v21 = vpop.f32.mrf.mxu1 }
 0x6bb   : > { %2468 = vmatmul.msk.f32.vlgmr.msrb.gmra.mxu2 %vm1776_vm11, %v1768_v21 }
 0x6bc   : > { %1906 = vmatpush.msrb.mxu2 %v1889_v32 }
 0x6be   : > { %1907 = vmatpush.msrb.mxu2 %v1888_v33 }
 0x6c0   : > { %1908 = vmatpush.msrb.mxu2 %v1887_v41 }
 0x6c2   : > { %1909 = vmatpush.msrb.mxu2 %v1886_v42 }
 0x6c3   : > { %2470 = vmatmul.msk.f32.vlgmr.msra.gmra.mxu2 %vm1776_vm11, %v1828_v23 }
 0x6c4   : > { %1937 = vmatpush.msra.mxu2 %v1921_v43 }
 0x6c6   : > { %1938 = vmatpush.msra.mxu2 %v1920_v44 }
 0x6c8   : > { %1939 = vmatpush.msra.mxu2 %v1919_v48 }
 0x6ca   : > { %1940 = vmatpush.msra.mxu2 %v1918_v49 }
 0x73e   : > { %v1797_v35 = vpop.f32.mrf.mxu2 }
 0x73f   : > { %v1798_v36 = vadd.f32 %v1797_v35, %v1775_v34 }
 0x741   : > { %2474 = vmatmul.msk.f32.vlgmr.msra.gmra.mxu1 %vm1776_vm11, %v1798_v36 }
 0x746   : > { %v1854_v38 = vpop.f32.mrf.mxu2 }
 0x747   : > { %v1855_v39 = vadd.f32 %v1854_v38, %v1833_v37 }
 0x749   : > { %v1857_v40 = vmax.f32 %v1855_v39, 0.0 }
 0x74b   : > { %2471 = vmatmul.msk.f32.vlgmr.msra.gmra.mxu3 %vm1776_vm11, %v1857_v40 }
 0x7be   : > { %v1965_v2 = vpop.f32.mrf.mxu1 }
 0x7ce   : > { %v1883_v46 = vpop.f32.mrf.mxu3 }
 0x7cf   : > { %v1884_v47 = vadd.f32 %v1883_v46, %v1862_v45 }
 0x7d1   : > { %2472 = vmatmul.msk.f32.vlgmr.msrb.gmra.mxu2 %vm1776_vm11, %v1884_v47 }
 0x854   : > { %v1911_v55 = vpop.f32.mrf.mxu2 }
 0x855   : > { %v1912_v56 = vadd.f32 %v1911_v55, %v1890_v54 }
 0x857   : > { %2473 = vmatmul.msk.f32.vlgmr.msra.gmra.mxu2 %vm1776_vm11, %v1912_v56 }
 0x8da   : > { %v1942_v3 = vpop.f32.mrf.mxu2 }
 0x8db   : > { %v1966_v5 = vadd.f32 %v1965_v2, %v1942_v3 }
 0x8dd   : > { %v1969_v6 = vadd.f32 %v1968_v4, %v1966_v5 }
 0x8df   : > { %v1970_v7 = vmax.f32 %v1969_v6, 0.0 }
 0x8e1   : > { %2475 = vmatmul.msk.f32.vlgmr.msrb.gmra.mxu3 %vm1249_vm2, %v1970_v7 }
 0x964   : > { %v2000_v12 = vpop.f32.mrf.mxu3 }
 0x965   : > { %v2001_v13 = vadd.f32 %v2000_v12, %v1979_v11 }
 0x967   : > { %v2003_v14 = vmax.f32 %v2001_v13, 0.0 }
 0x969   : > { %2476 = vmatmul.msk.f32.vlgmr.msrb.gmra.mxu0 %vm1249_vm2, %v2003_v14 }
 0x9e6   : > { %v2033_v16 = vpop.f32.mrf.mxu0 }
 0x9e7   : > { %v2034_v17 = vadd.f32 %v2033_v16, %v2012_v15 }
 0x9e9   : > { %v2037_v18 = vsel %vm2036_vm12, %v2034_v17, -inf }
 0x9ea   : > { %2038 = vmax.xlane.f32.xlu2 %v2037_v18 }
 0xa5d   : > { %v2039_v19 = vpop.xlane.xlu2 %2038 }
 0xa5e   : > { %v2040_v20 = vsub.f32 %v2034_v17, %v2039_v19 }
 0xa60   : > { %v2041_v21 = vmul.f32 1.442695, %v2040_v20 }
 0xa62   : > { %2744 = vpow2.f32 %v2041_v21 }
 0xa68   : > { %v2745_v22 = vpop.eup %2744 }
 0xa69   : > { %v2043_v23 = vsel %vm2036_vm12, %v2745_v22, 0.0 }
 0xa6a   : > { %2044 = vadd.xlane.f32.xlu2 %v2043_v23 }
 0xadd   : > { %v2045_v24 = vpop.xlane.xlu2 %2044 }
 0xade   : > { %2746 = vrcp.f32 %v2045_v24  ;;  %v2057_v28 = vand.u32 2147483648, %v2045_v24  ;;  %v2055_v30 = vand.u32 2147483647, %v2045_v24  ;;  %vm2051_vm14 = vweird.f32 %v2045_v24 }
 0xae0   : > { %v2058_v32 = vor.u32 1.1754944e-38, %v2057_v28  ;;  %vm2056_vm0 = vcmp.eq.f32.partialorder %v2055_v30, 8.507059e+37 }
 0xae4   : > { %v2747_v25 = vpop.eup %2746 }
 0xae5   : > { %v2047_v26 = vmul.f32 %v2747_v25, %v2045_v24  ;;  %vm2052_vm13 = vweird.f32 %v2747_v25 }
 0xae6   : > { %vm2053_vm15 = vmor %vm2051_vm14, %vm2052_vm13 }
 0xae7   : > { %v2048_v27 = vsub.f32 1.0, %v2047_v26 }
 0xae9   : > { %v2049_v29 = vmul.f32 %v2747_v25, %v2048_v27 }
 0xaeb   : > { %v2050_v31 = vadd.f32 %v2747_v25, %v2049_v29 }
 0xaed   : > { %v2054_v33 = vsel %vm2053_vm15, %v2747_v25, %v2050_v31 }
 0xaee   : > { %v2059_v34 = vsel %vm2056_vm0, %v2058_v32, %v2054_v33 }
 0xaef   : > { %v2060_v35 = vmul.f32 %v2745_v22, %v2059_v34 }
 0xaf1   : > { %2061 = vst.msk [vmem:[%s1214_s6] sm:$0x1] %vm2036_vm12, %v2060_v35 }
 0xaf2   : > { %3345 = shalt.err (!%p3342_p13)
}
 0xaf3   : > { %2554 = dma.vmem_to_hbm [thread:$0]  (%p3942_p2), %s2074_s12, 16, %s2076_s13, %s2063_s16  }
 0xaf4 PF: > { %s2087_s15 = sand.u32 1, %s3408_s7   ;;  %p4269_p1 = scmp.ne.s32.totalorder %s4237_s1, 0 }
 0xaf5   : > { %p4270_p5 = scmp.ge.s32.totalorder %s3420_s0, 2  ;;  %s2088_s18 = scalar_lea.sflag [#allocation4], %s2087_s15 }
 0xaf7   : > { %p2616_p3 = pnand %p4270_p5, %p4269_p1 }
 0xaf9   : > { %p2617_p11 = pneg %p2616_p3 }
 0xafb   : > { %3403 = dma.done.wait (%p2617_p11), %s2088_s18, 16  }
 0xafc   : > { %3405 = vsyncadd (%p2617_p11), %s2088_s18, 4294967280  ;;  %p81_p0 = scmp.ge.s32.totalorder %s3916_s28, 4   ;;  %s4271_s7 = smov %s3412_s10 }
 0xafd   : > { %s4272_s10 = smov %s3416_s11  ;;  %s4273_s11 = smov %s3927_s2 }
 0xafe   : > { %s4274_s0 = smov %s3916_s28  ;;  %83 = sbr.rel (!%p81_p0) target bundleno = 68 (0x44), region = 291 }
 0xb03   :  { %2093 = vsyncpa [#allocation3], 1 }
 0xb04   :  { %2095 = vsyncpa [#allocation3 + $0x1], 1 }
 0xb05   :  { %2096 = vsyncpa [#allocation6], 1 }
 0xb06   :  { %2097 = vsyncpa [#allocation9], 1 }
 0xb07   :  { %2098 = vsyncpa [#allocation12], 1 }
 0xb08   :  { %2099 = vsyncpa [#allocation15], 1 }
 0xb09   :  { %2100 = vsyncpa [#allocation18], 1 }
 0xb0a   :  { %2101 = vsyncpa [#allocation21], 1 }
 0xb0b   :  { %2102 = vsyncpa [#allocation24], 1 }
 0xb0c   :  { %2103 = vsyncpa [#allocation27], 1 }
 0xb0d   :  { %2104 = vsyncpa [#allocation30], 1 }
 0xb0e   :  { %2105 = vsyncpa [#allocation4], 1 }
 0xb0f   :  { %2107 = vsyncpa [#allocation4 + $0x1], 1 }

</bundles_post_ra>
